<compile_context>
chip_gen: v5e
topology: v5e:2x2
jax: 0.10.0
libtpu: 0.0.40
codegen_flags: <defaults>
</compile_context>

<pallas_src>
from functools import partial

import jax
import jax.numpy as jnp
from jax import lax
from jax.experimental import pallas as pl
from jax.experimental.pallas import tpu as pltpu

EXPANSION = 4
BN_EPS = 1e-5

# Use the K=3C horizontal-tap concat only while C is narrower than the MXU
# contraction depth; at real ResNet widths issue 9 separate accumulating dots.
_CONCAT_K_MAX_C = 128


# ----------------------------------------------------------------------------
# Fused Pallas kernel
# ----------------------------------------------------------------------------
def _bottleneck_kernel(xc_ref, xt_ref, xb_ref,
                       w1_ref, b1_ref, w2_ref, b2_ref, w3_ref, b3_ref,
                       o_ref, t1_ref, *, TH, W, C, Cout, concat_k):
    """One grid step = one (batch, row-tile).

    xc_ref : (TH, W, Cin)       x center rows (also the residual)
    xt_ref : (1, W, Cin)        x top-halo row   (row r*TH-1, clamped)
    xb_ref : (1, W, Cin)        x bottom-halo row (row r*TH+TH, clamped)
    w1_ref : (Cin, C)     bf16  conv1 weights, BN1 scale folded
    b1_ref : (1, C)       f32
    w2_ref : (3, 3C, C) or (9, C, C)  bf16  conv2 weights, BN2 folded
    b2_ref : (1, C)       f32
    w3_ref : (C, Cout)    bf16  conv3 weights, BN3 folded
    b3_ref : (1, Cout)    f32
    o_ref  : (TH, W, Cout)      output row tile
    t1_ref : (TH+2, W, C) bf16  VMEM scratch: relu(bn1(conv1(x))) with row halo
    """
    r = pl.program_id(1)
    nr = pl.num_programs(1)
    f32 = jnp.float32
    bf16 = jnp.bfloat16

    def conv1(rows):
        # rows: (n, W, Cin) -> (n, W, C) bf16, folded-BN bias + ReLU fused.
        n, _, cin = rows.shape
        y = jnp.dot(rows.reshape(n * W, cin).astype(bf16), w1_ref[...],
                    preferred_element_type=f32)
        y = jnp.maximum(y + b1_ref[...], 0.0)
        return y.reshape(n, W, C).astype(bf16)          # single cast at store

    # --- stage 1: t1 = relu(bn1(conv1(x))) for this tile + 1-row halo --------
    xc = xc_ref[...]                                     # (TH, W, Cin)
    t1_ref[pl.ds(1, TH), :, :] = conv1(xc)

    top = conv1(xt_ref[...])                             # (1, W, C)
    t1_ref[pl.ds(0, 1), :, :] = jnp.where(r > 0, top, jnp.zeros_like(top))
    bot = conv1(xb_ref[...])                             # (1, W, C)
    t1_ref[pl.ds(TH + 1, 1), :, :] = jnp.where(r < nr - 1, bot,
                                               jnp.zeros_like(bot))

    # --- stage 2: t2 = relu(bn2(conv3x3(t1))) --------------------------------
    zcol = jnp.zeros((TH, 1, C), bf16)                   # hoisted out of loop
    acc = jnp.zeros((TH * W, C), f32)
    for dy in range(3):
        rows = t1_ref[pl.ds(dy, TH), :, :]               # (TH, W, C) aligned
        # horizontal taps built in-register (padding=1 semantics on columns)
        left = jnp.concatenate([zcol, rows[:, :W - 1, :]], axis=1)   # kw=0
        right = jnp.concatenate([rows[:, 1:, :], zcol], axis=1)      # kw=2
        if concat_k:
            patch = jnp.concatenate([left, rows, right], axis=-1)    # (TH,W,3C)
            acc = acc + jnp.dot(patch.reshape(TH * W, 3 * C), w2_ref[dy],
                                preferred_element_type=f32)
        else:
            for dx, tap in enumerate((left, rows, right)):
                acc = acc + jnp.dot(tap.reshape(TH * W, C),
                                    w2_ref[dy * 3 + dx],
                                    preferred_element_type=f32)
    t2 = jnp.maximum(acc + b2_ref[...], 0.0).astype(bf16)            # (TH*W, C)

    # --- stage 3: out = relu(bn3(conv3(t2)) + residual) ----------------------
    y3 = jnp.dot(t2, w3_ref[...], preferred_element_type=f32) + b3_ref[...]
    res = xc.astype(f32).reshape(TH * W, Cout)           # residual stays f32
    out = jnp.maximum(y3 + res, 0.0).reshape(TH, W, Cout)
    o_ref[...] = out.astype(o_ref.dtype)


# ----------------------------------------------------------------------------
# Wrapper
# ----------------------------------------------------------------------------
def _fold_bn(gamma, beta, mean, var, eps=BN_EPS):
    scale = gamma / jnp.sqrt(var + eps)
    bias = beta - mean * scale
    return scale[None, :], bias[None, :]


def _pick_row_tile(H, W, cap=2048):
    th = 8 if H % 8 == 0 else H
    # grow the tile while it divides H, keeps >= 2 row tiles and bounds area
    while th * 4 <= H and H % (th * 2) == 0 and th * 2 * W <= cap:
        th *= 2
    return th


def _vmem_budget_bytes(TH, W, Cin, C, Cout, x_itemsize, concat_k):
    bf2, f4 = 2, 4
    est = (2 * TH * W * Cin * x_itemsize            # x center tile (dbl-buf)
           + 2 * 2 * W * Cin * x_itemsize           # 2 halo rows (dbl-buf)
           + 2 * TH * W * Cout * x_itemsize         # output tile (dbl-buf)
           + 2 * (Cin * C + 9 * C * C + C * Cout) * bf2   # bf16 weights
           + 2 * (2 * C + Cout) * f4                # folded biases
           + (TH + 2) * W * C * bf2                 # t1 scratch (bf16)
           + TH * W * C * f4                        # acc
           + 2 * TH * W * Cout * f4                 # y3 / residual temporaries
           + 4 * TH * W * C * bf2                   # rows/left/right/t2 temps
           + (TH * W * 3 * C * bf2 if concat_k else 0))   # concat patch
    want = est + est // 4 + (8 << 20)
    # stay under v7x's 64 MiB physical VMEM per TensorCore
    return int(max(16 << 20, min(want, 48 << 20)))


def bottleneck_caffe_pallas_nhwc(x_nhwc, params, stride=1):
    """Fused Pallas forward pass on NHWC data. Output dtype follows x."""
    N, H, W, Cin = x_nhwc.shape
    planes = params["w1"].shape[0]
    Cout = planes * EXPANSION
    # downsample=None path only (residual added unprojected).
    assert stride == 1 and Cin == Cout, (
        "downsample=None requires stride=1 and inplanes == planes*expansion")

    TH = _pick_row_tile(H, W)
    assert H % TH == 0, f"row tile {TH} must divide H={H}"

    s1, b1 = _fold_bn(*params["bn1"])
    s2, b2 = _fold_bn(*params["bn2"])
    s3, b3 = _fold_bn(*params["bn3"])

    # Fold BN scale into weights; pre-cast weights to bf16 (accumulation f32).
    w1 = (jnp.transpose(params["w1"][:, :, 0, 0], (1, 0)) * s1).astype(jnp.bfloat16)  # (Cin, C)
    w2_io = jnp.transpose(params["w2"], (2, 3, 1, 0)) * s2                            # (kh,kw,C,C)
    concat_k = planes <= _CONCAT_K_MAX_C
    if concat_k:
        w2p = jnp.concatenate([w2_io[:, 0], w2_io[:, 1], w2_io[:, 2]],
                              axis=1).astype(jnp.bfloat16)                            # (3, 3C, C)
        w2_spec = pl.BlockSpec((3, 3 * planes, planes), lambda n, r: (0, 0, 0))
    else:
        w2p = w2_io.reshape(9, planes, planes).astype(jnp.bfloat16)                   # (9, C, C)
        w2_spec = pl.BlockSpec((9, planes, planes), lambda n, r: (0, 0, 0))
    w3 = (jnp.transpose(params["w3"][:, :, 0, 0], (1, 0)) * s3).astype(jnp.bfloat16)  # (C, Cout)

    kernel = partial(_bottleneck_kernel, TH=TH, W=W, C=planes, Cout=Cout,
                     concat_k=concat_k)

    # Per-row-tile center block + 1-row clamped halo blocks (no full-image
    # resident block -> no duplicate image DMA when the row axis is core-sharded).
    center_map = lambda n, r: (n, r, 0, 0)
    top_map = lambda n, r: (n, jnp.maximum(r * TH - 1, 0), 0, 0)
    bot_map = lambda n, r: (n, jnp.minimum((r + 1) * TH, H - 1), 0, 0)

    out = pl.pallas_call(
        kernel,
        out_shape=jax.ShapeDtypeStruct((N, H, W, Cout), x_nhwc.dtype),
        grid=(N, H // TH),
        in_specs=[
            pl.BlockSpec((None, TH, W, Cin), center_map),
            pl.BlockSpec((None, 1, W, Cin), top_map),
            pl.BlockSpec((None, 1, W, Cin), bot_map),
            pl.BlockSpec((Cin, planes), lambda n, r: (0, 0)),
            pl.BlockSpec((1, planes), lambda n, r: (0, 0)),
            w2_spec,
            pl.BlockSpec((1, planes), lambda n, r: (0, 0)),
            pl.BlockSpec((planes, Cout), lambda n, r: (0, 0)),
            pl.BlockSpec((1, Cout), lambda n, r: (0, 0)),
        ],
        out_specs=pl.BlockSpec((None, TH, W, Cout), lambda n, r: (n, r, 0, 0)),
        scratch_shapes=[pltpu.VMEM((TH + 2, W, planes), jnp.bfloat16)],
        compiler_params=pltpu.CompilerParams(
            dimension_semantics=("parallel", "parallel"),
            vmem_limit_bytes=_vmem_budget_bytes(
                TH, W, Cin, planes, Cout, x_nhwc.dtype.itemsize, concat_k)),
    )(x_nhwc, x_nhwc, x_nhwc, w1, b1, w2p, b2, w3, b3)
    return out


def bottleneck_caffe_pallas(x_nchw, params, stride=1):
    """PyTorch-compatible NCHW interface. For full networks keep NHWC end-to-end
    and call bottleneck_caffe_pallas_nhwc to avoid per-block transposes."""
    x = jnp.transpose(x_nchw, (0, 2, 3, 1))
    out = bottleneck_caffe_pallas_nhwc(x, params, stride=stride)
    return jnp.transpose(out, (0, 3, 1, 2))


# ----------------------------------------------------------------------------
# Pure-JAX f32 reference (for correctness check)
# ----------------------------------------------------------------------------
def bottleneck_caffe_ref(x, params, stride=1):
    def conv(x, w, s, p):
        return lax.conv_general_dilated(
            x, w, (s, s), [(p, p), (p, p)],
            dimension_numbers=("NCHW", "OIHW", "NCHW"))

    def bn(y, prm):
        gamma, beta, mean, var = prm
        inv = gamma / jnp.sqrt(var + BN_EPS)
        return (y - mean[None, :, None, None]) * inv[None, :, None, None] \
            + beta[None, :, None, None]

    out = jax.nn.relu(bn(conv(x, params["w1"], stride, 0), params["bn1"]))
    out = jax.nn.relu(bn(conv(out, params["w2"], 1, 1), params["bn2"]))
    out = bn(conv(out, params["w3"], 1, 0), params["bn3"])
    out = out + x  # downsample is None
    return jax.nn.relu(out)


# ----------------------------------------------------------------------------
# main
# ----------------------------------------------------------------------------
def _bn_params(key, c):
    k1, k2, k3, k4 = jax.random.split(key, 4)
    gamma = 1.0 + 0.1 * jax.random.normal(k1, (c,), jnp.float32)
    beta = 0.1 * jax.random.normal(k2, (c,), jnp.float32)
    mean = 0.05 * jax.random.normal(k3, (c,), jnp.float32)
    var = 1.0 + 0.1 * jax.random.uniform(k4, (c,), jnp.float32)
    return gamma, beta, mean, var


if __name__ == "__main__":
    # Residual add with downsample=None requires inplanes == planes*expansion
    # and stride == 1.
    N, H, W = 2, 16, 16
    planes = 8
    inplanes = planes * EXPANSION  # 32
    stride = 1

    key = jax.random.PRNGKey(0)
    ks = jax.random.split(key, 8)

    params = {
        "w1": 0.1 * jax.random.normal(ks[0], (planes, inplanes, 1, 1), jnp.float32),
        "w2": 0.1 * jax.random.normal(ks[1], (planes, planes, 3, 3), jnp.float32),
        "w3": 0.1 * jax.random.normal(ks[2], (planes * EXPANSION, planes, 1, 1), jnp.float32),
        "bn1": _bn_params(ks[3], planes),
        "bn2": _bn_params(ks[4], planes),
        "bn3": _bn_params(ks[5], planes * EXPANSION),
    }

    x = jax.random.normal(ks[6], (N, inplanes, H, W), jnp.float32)

    out = jax.jit(partial(bottleneck_caffe_pallas, stride=stride))(x, params)
    out = jax.block_until_ready(out)

    ref = jax.block_until_ready(bottleneck_caffe_ref(x, params, stride=stride))

    max_err = float(jnp.max(jnp.abs(out - ref)))
    assert out.shape == (N, planes * EXPANSION, H, W), out.shape
    # bf16 MXU operands with f32 accumulation vs a pure-f32 reference.
    assert max_err < 2e-2, f"max abs error {max_err}"

    print("KERNEL_OK")
</pallas_src>

<mosaic_0001>
module attributes {stable_mosaic.version = 11 : i64} {
  func.func @_bottleneck_kernel(%arg0: i32, %arg1: i32, %arg2: memref<1x8x16x32xf32, #tpu.memory_space<vmem>>, %arg3: memref<1x1x16x32xf32, #tpu.memory_space<vmem>>, %arg4: memref<1x1x16x32xf32, #tpu.memory_space<vmem>>, %arg5: memref<32x8xbf16, #tpu.memory_space<vmem>>, %arg6: memref<1x8xf32, #tpu.memory_space<vmem>>, %arg7: memref<3x24x8xbf16, #tpu.memory_space<vmem>>, %arg8: memref<1x8xf32, #tpu.memory_space<vmem>>, %arg9: memref<8x32xbf16, #tpu.memory_space<vmem>>, %arg10: memref<1x32xf32, #tpu.memory_space<vmem>>, %arg11: memref<1x8x16x32xf32, #tpu.memory_space<vmem>>, %arg12: memref<10x16x8xbf16, #tpu.memory_space<vmem>>) attributes {dimension_semantics = [#tpu.dimension_semantics<parallel>, #tpu.dimension_semantics<parallel>], iteration_bounds = array<i64: 2, 2>, scalar_prefetch = 0 : i64, scratch_operands = 1 : i64, tpu.core_type = #tpu.core_type<tc>, window_params = [{transform_indices = @transform_0, window_bounds = array<i64: 1, 8, 16, 32>}, {transform_indices = @transform_1, window_bounds = array<i64: 1, 1, 16, 32>}, {transform_indices = @transform_2, window_bounds = array<i64: 1, 1, 16, 32>}, {pipeline_mode = #tpu.pipeline_mode<synchronous>, transform_indices = @transform_3, window_bounds = array<i64: 32, 8>}, {pipeline_mode = #tpu.pipeline_mode<synchronous>, transform_indices = @transform_4, window_bounds = array<i64: 1, 8>}, {pipeline_mode = #tpu.pipeline_mode<synchronous>, transform_indices = @transform_5, window_bounds = array<i64: 3, 24, 8>}, {pipeline_mode = #tpu.pipeline_mode<synchronous>, transform_indices = @transform_6, window_bounds = array<i64: 1, 8>}, {pipeline_mode = #tpu.pipeline_mode<synchronous>, transform_indices = @transform_7, window_bounds = array<i64: 8, 32>}, {pipeline_mode = #tpu.pipeline_mode<synchronous>, transform_indices = @transform_8, window_bounds = array<i64: 1, 32>}, {transform_indices = @transform_9, window_bounds = array<i64: 1, 8, 16, 32>}]} {
    %c0 = arith.constant 0 : index
    %c0_0 = arith.constant 0 : index
    %c0_1 = arith.constant 0 : index
    %c0_2 = arith.constant 0 : index
    %0 = vector.load %arg2[%c0, %c0_0, %c0_1, %c0_2] : memref<1x8x16x32xf32, #tpu.memory_space<vmem>>, vector<1x8x16x32xf32>
    %1 = vector.shape_cast %0 : vector<1x8x16x32xf32> to vector<8x16x32xf32>
    %2 = vector.shape_cast %1 : vector<8x16x32xf32> to vector<128x32xf32>
    %3 = arith.truncf %2 : vector<128x32xf32> to vector<128x32xbf16>
    %c0_3 = arith.constant 0 : index
    %c0_4 = arith.constant 0 : index
    %4 = vector.load %arg5[%c0_3, %c0_4] : memref<32x8xbf16, #tpu.memory_space<vmem>>, vector<32x8xbf16>
    %cst = arith.constant dense<0.000000e+00> : vector<128x8xf32>
    %5 = tpu.matmul %3, %4, %cst {dimension_numbers = #tpu.dot_dimension_numbers<[1], [0], [0], [1], [0, 0, 1, 1], [], []>} : vector<128x32xbf16>, vector<32x8xbf16>, vector<128x8xf32> -> vector<128x8xf32>
    %c0_5 = arith.constant 0 : index
    %c0_6 = arith.constant 0 : index
    %6 = vector.load %arg6[%c0_5, %c0_6] : memref<1x8xf32, #tpu.memory_space<vmem>>, vector<1x8xf32>
    %7 = vector.broadcast %6 : vector<1x8xf32> to vector<128x8xf32>
    %8 = arith.addf %5, %7 : vector<128x8xf32>
    %cst_7 = arith.constant 0.000000e+00 : f32
    %9 = vector.broadcast %cst_7 : f32 to vector<128x8xf32>
    %10 = arith.maximumf %8, %9 : vector<128x8xf32>
    %11 = vector.shape_cast %10 : vector<128x8xf32> to vector<8x16x8xf32>
    %12 = arith.truncf %11 : vector<8x16x8xf32> to vector<8x16x8xbf16>
    %c1 = arith.constant 1 : index
    %c0_8 = arith.constant 0 : index
    %c0_9 = arith.constant 0 : index
    %13 = vector.load %arg12[%c1, %c0_8, %c0_9] : memref<10x16x8xbf16, #tpu.memory_space<vmem>>, vector<8x16x8xbf16>
    tpu.vector_store %arg12[%c1, %c0_8, %c0_9], %12 {strides = array<i32>} : memref<10x16x8xbf16, #tpu.memory_space<vmem>>, vector<8x16x8xbf16>,
    %c0_10 = arith.constant 0 : index
    %c0_11 = arith.constant 0 : index
    %c0_12 = arith.constant 0 : index
    %c0_13 = arith.constant 0 : index
    %14 = vector.load %arg3[%c0_10, %c0_11, %c0_12, %c0_13] : memref<1x1x16x32xf32, #tpu.memory_space<vmem>>, vector<1x1x16x32xf32>
    %15 = vector.shape_cast %14 : vector<1x1x16x32xf32> to vector<1x16x32xf32>
    %16 = vector.shape_cast %15 : vector<1x16x32xf32> to vector<16x32xf32>
    %17 = arith.truncf %16 : vector<16x32xf32> to vector<16x32xbf16>
    %c0_14 = arith.constant 0 : index
    %c0_15 = arith.constant 0 : index
    %18 = vector.load %arg5[%c0_14, %c0_15] : memref<32x8xbf16, #tpu.memory_space<vmem>>, vector<32x8xbf16>
    %cst_16 = arith.constant dense<0.000000e+00> : vector<16x8xf32>
    %19 = tpu.matmul %17, %18, %cst_16 {dimension_numbers = #tpu.dot_dimension_numbers<[1], [0], [0], [1], [0, 0, 1, 1], [], []>} : vector<16x32xbf16>, vector<32x8xbf16>, vector<16x8xf32> -> vector<16x8xf32>
    %c0_17 = arith.constant 0 : index
    %c0_18 = arith.constant 0 : index
    %20 = vector.load %arg6[%c0_17, %c0_18] : memref<1x8xf32, #tpu.memory_space<vmem>>, vector<1x8xf32>
    %21 = vector.broadcast %20 : vector<1x8xf32> to vector<16x8xf32>
    %22 = arith.addf %19, %21 : vector<16x8xf32>
    %cst_19 = arith.constant 0.000000e+00 : f32
    %23 = vector.broadcast %cst_19 : f32 to vector<16x8xf32>
    %24 = arith.maximumf %22, %23 : vector<16x8xf32>
    %25 = vector.shape_cast %24 : vector<16x8xf32> to vector<1x16x8xf32>
    %26 = arith.truncf %25 : vector<1x16x8xf32> to vector<1x16x8xbf16>
    %c0_i32 = arith.constant 0 : i32
    %27 = arith.cmpi sgt, %arg1, %c0_i32 : i32
    %cst_20 = arith.constant 0.000000e+00 : bf16
    %28 = vector.broadcast %cst_20 : bf16 to vector<1x16x8xbf16>
    %29 = arith.select %27, %26, %28 : vector<1x16x8xbf16>
    %c0_21 = arith.constant 0 : index
    %c0_22 = arith.constant 0 : index
    %c0_23 = arith.constant 0 : index
    %30 = vector.load %arg12[%c0_21, %c0_22, %c0_23] : memref<10x16x8xbf16, #tpu.memory_space<vmem>>, vector<1x16x8xbf16>
    tpu.vector_store %arg12[%c0_21, %c0_22, %c0_23], %29 {strides = array<i32>} : memref<10x16x8xbf16, #tpu.memory_space<vmem>>, vector<1x16x8xbf16>,
    %c0_24 = arith.constant 0 : index
    %c0_25 = arith.constant 0 : index
    %c0_26 = arith.constant 0 : index
    %c0_27 = arith.constant 0 : index
    %31 = vector.load %arg4[%c0_24, %c0_25, %c0_26, %c0_27] : memref<1x1x16x32xf32, #tpu.memory_space<vmem>>, vector<1x1x16x32xf32>
    %32 = vector.shape_cast %31 : vector<1x1x16x32xf32> to vector<1x16x32xf32>
    %33 = vector.shape_cast %32 : vector<1x16x32xf32> to vector<16x32xf32>
    %34 = arith.truncf %33 : vector<16x32xf32> to vector<16x32xbf16>
    %c0_28 = arith.constant 0 : index
    %c0_29 = arith.constant 0 : index
    %35 = vector.load %arg5[%c0_28, %c0_29] : memref<32x8xbf16, #tpu.memory_space<vmem>>, vector<32x8xbf16>
    %cst_30 = arith.constant dense<0.000000e+00> : vector<16x8xf32>
    %36 = tpu.matmul %34, %35, %cst_30 {dimension_numbers = #tpu.dot_dimension_numbers<[1], [0], [0], [1], [0, 0, 1, 1], [], []>} : vector<16x32xbf16>, vector<32x8xbf16>, vector<16x8xf32> -> vector<16x8xf32>
    %c0_31 = arith.constant 0 : index
    %c0_32 = arith.constant 0 : index
    %37 = vector.load %arg6[%c0_31, %c0_32] : memref<1x8xf32, #tpu.memory_space<vmem>>, vector<1x8xf32>
    %38 = vector.broadcast %37 : vector<1x8xf32> to vector<16x8xf32>
    %39 = arith.addf %36, %38 : vector<16x8xf32>
    %cst_33 = arith.constant 0.000000e+00 : f32
    %40 = vector.broadcast %cst_33 : f32 to vector<16x8xf32>
    %41 = arith.maximumf %39, %40 : vector<16x8xf32>
    %42 = vector.shape_cast %41 : vector<16x8xf32> to vector<1x16x8xf32>
    %43 = arith.truncf %42 : vector<1x16x8xf32> to vector<1x16x8xbf16>
    %c1_i32 = arith.constant 1 : i32
    %44 = arith.cmpi slt, %arg1, %c1_i32 : i32
    %cst_34 = arith.constant 0.000000e+00 : bf16
    %45 = vector.broadcast %cst_34 : bf16 to vector<1x16x8xbf16>
    %46 = arith.select %44, %43, %45 : vector<1x16x8xbf16>
    %c9 = arith.constant 9 : index
    %c0_35 = arith.constant 0 : index
    %c0_36 = arith.constant 0 : index
    %47 = vector.load %arg12[%c9, %c0_35, %c0_36] : memref<10x16x8xbf16, #tpu.memory_space<vmem>>, vector<1x16x8xbf16>
    tpu.vector_store %arg12[%c9, %c0_35, %c0_36], %46 {strides = array<i32>} : memref<10x16x8xbf16, #tpu.memory_space<vmem>>, vector<1x16x8xbf16>,
    %cst_37 = arith.constant 0.000000e+00 : bf16
    %48 = vector.broadcast %cst_37 : bf16 to vector<8x1x8xbf16>
    %cst_38 = arith.constant 0.000000e+00 : f32
    %49 = vector.broadcast %cst_38 : f32 to vector<128x8xf32>
    %c0_39 = arith.constant 0 : index
    %c0_40 = arith.constant 0 : index
    %c0_41 = arith.constant 0 : index
    %50 = vector.load %arg12[%c0_39, %c0_40, %c0_41] : memref<10x16x8xbf16, #tpu.memory_space<vmem>>, vector<8x16x8xbf16>
    %51 = vector.extract_strided_slice %50 {offsets = [0, 0, 0], sizes = [8, 15, 8], strides = [1, 1, 1]} : vector<8x16x8xbf16> to vector<8x15x8xbf16>
    %52 = tpu.concatenate %48, %51 in 1 : vector<8x1x8xbf16>, vector<8x15x8xbf16> -> vector<8x16x8xbf16>
    %53 = vector.extract_strided_slice %50 {offsets = [0, 1, 0], sizes = [8, 15, 8], strides = [1, 1, 1]} : vector<8x16x8xbf16> to vector<8x15x8xbf16>
    %54 = tpu.concatenate %53, %48 in 1 : vector<8x15x8xbf16>, vector<8x1x8xbf16> -> vector<8x16x8xbf16>
    %55 = tpu.concatenate %52, %50, %54 in 2 : vector<8x16x8xbf16>, vector<8x16x8xbf16>, vector<8x16x8xbf16> -> vector<8x16x24xbf16>
    %56 = vector.shape_cast %55 : vector<8x16x24xbf16> to vector<128x24xbf16>
    %c0_42 = arith.constant 0 : index
    %c0_43 = arith.constant 0 : index
    %c0_44 = arith.constant 0 : index
    %57 = vector.load %arg7[%c0_42, %c0_43, %c0_44] : memref<3x24x8xbf16, #tpu.memory_space<vmem>>, vector<1x24x8xbf16>
    %58 = vector.shape_cast %57 : vector<1x24x8xbf16> to vector<24x8xbf16>
    %cst_45 = arith.constant dense<0.000000e+00> : vector<128x8xf32>
    %59 = tpu.matmul %56, %58, %cst_45 {dimension_numbers = #tpu.dot_dimension_numbers<[1], [0], [0], [1], [0, 0, 1, 1], [], []>} : vector<128x24xbf16>, vector<24x8xbf16>, vector<128x8xf32> -> vector<128x8xf32>
    %60 = arith.addf %49, %59 : vector<128x8xf32>
    %c1_46 = arith.constant 1 : index
    %c0_47 = arith.constant 0 : index
    %c0_48 = arith.constant 0 : index
    %61 = vector.load %arg12[%c1_46, %c0_47, %c0_48] : memref<10x16x8xbf16, #tpu.memory_space<vmem>>, vector<8x16x8xbf16>
    %62 = vector.extract_strided_slice %61 {offsets = [0, 0, 0], sizes = [8, 15, 8], strides = [1, 1, 1]} : vector<8x16x8xbf16> to vector<8x15x8xbf16>
    %63 = tpu.concatenate %48, %62 in 1 : vector<8x1x8xbf16>, vector<8x15x8xbf16> -> vector<8x16x8xbf16>
    %64 = vector.extract_strided_slice %61 {offsets = [0, 1, 0], sizes = [8, 15, 8], strides = [1, 1, 1]} : vector<8x16x8xbf16> to vector<8x15x8xbf16>
    %65 = tpu.concatenate %64, %48 in 1 : vector<8x15x8xbf16>, vector<8x1x8xbf16> -> vector<8x16x8xbf16>
    %66 = tpu.concatenate %63, %61, %65 in 2 : vector<8x16x8xbf16>, vector<8x16x8xbf16>, vector<8x16x8xbf16> -> vector<8x16x24xbf16>
    %67 = vector.shape_cast %66 : vector<8x16x24xbf16> to vector<128x24xbf16>
    %c1_49 = arith.constant 1 : index
    %c0_50 = arith.constant 0 : index
    %c0_51 = arith.constant 0 : index
    %68 = vector.load %arg7[%c1_49, %c0_50, %c0_51] : memref<3x24x8xbf16, #tpu.memory_space<vmem>>, vector<1x24x8xbf16>
    %69 = vector.shape_cast %68 : vector<1x24x8xbf16> to vector<24x8xbf16>
    %cst_52 = arith.constant dense<0.000000e+00> : vector<128x8xf32>
    %70 = tpu.matmul %67, %69, %cst_52 {dimension_numbers = #tpu.dot_dimension_numbers<[1], [0], [0], [1], [0, 0, 1, 1], [], []>} : vector<128x24xbf16>, vector<24x8xbf16>, vector<128x8xf32> -> vector<128x8xf32>
    %71 = arith.addf %60, %70 : vector<128x8xf32>
    %c2 = arith.constant 2 : index
    %c0_53 = arith.constant 0 : index
    %c0_54 = arith.constant 0 : index
    %72 = vector.load %arg12[%c2, %c0_53, %c0_54] : memref<10x16x8xbf16, #tpu.memory_space<vmem>>, vector<8x16x8xbf16>
    %73 = vector.extract_strided_slice %72 {offsets = [0, 0, 0], sizes = [8, 15, 8], strides = [1, 1, 1]} : vector<8x16x8xbf16> to vector<8x15x8xbf16>
    %74 = tpu.concatenate %48, %73 in 1 : vector<8x1x8xbf16>, vector<8x15x8xbf16> -> vector<8x16x8xbf16>
    %75 = vector.extract_strided_slice %72 {offsets = [0, 1, 0], sizes = [8, 15, 8], strides = [1, 1, 1]} : vector<8x16x8xbf16> to vector<8x15x8xbf16>
    %76 = tpu.concatenate %75, %48 in 1 : vector<8x15x8xbf16>, vector<8x1x8xbf16> -> vector<8x16x8xbf16>
    %77 = tpu.concatenate %74, %72, %76 in 2 : vector<8x16x8xbf16>, vector<8x16x8xbf16>, vector<8x16x8xbf16> -> vector<8x16x24xbf16>
    %78 = vector.shape_cast %77 : vector<8x16x24xbf16> to vector<128x24xbf16>
    %c2_55 = arith.constant 2 : index
    %c0_56 = arith.constant 0 : index
    %c0_57 = arith.constant 0 : index
    %79 = vector.load %arg7[%c2_55, %c0_56, %c0_57] : memref<3x24x8xbf16, #tpu.memory_space<vmem>>, vector<1x24x8xbf16>
    %80 = vector.shape_cast %79 : vector<1x24x8xbf16> to vector<24x8xbf16>
    %cst_58 = arith.constant dense<0.000000e+00> : vector<128x8xf32>
    %81 = tpu.matmul %78, %80, %cst_58 {dimension_numbers = #tpu.dot_dimension_numbers<[1], [0], [0], [1], [0, 0, 1, 1], [], []>} : vector<128x24xbf16>, vector<24x8xbf16>, vector<128x8xf32> -> vector<128x8xf32>
    %82 = arith.addf %71, %81 : vector<128x8xf32>
    %c0_59 = arith.constant 0 : index
    %c0_60 = arith.constant 0 : index
    %83 = vector.load %arg8[%c0_59, %c0_60] : memref<1x8xf32, #tpu.memory_space<vmem>>, vector<1x8xf32>
    %84 = vector.broadcast %83 : vector<1x8xf32> to vector<128x8xf32>
    %85 = arith.addf %82, %84 : vector<128x8xf32>
    %cst_61 = arith.constant 0.000000e+00 : f32
    %86 = vector.broadcast %cst_61 : f32 to vector<128x8xf32>
    %87 = arith.maximumf %85, %86 : vector<128x8xf32>
    %88 = arith.truncf %87 : vector<128x8xf32> to vector<128x8xbf16>
    %c0_62 = arith.constant 0 : index
    %c0_63 = arith.constant 0 : index
    %89 = vector.load %arg9[%c0_62, %c0_63] : memref<8x32xbf16, #tpu.memory_space<vmem>>, vector<8x32xbf16>
    %cst_64 = arith.constant dense<0.000000e+00> : vector<128x32xf32>
    %90 = tpu.matmul %88, %89, %cst_64 {dimension_numbers = #tpu.dot_dimension_numbers<[1], [0], [0], [1], [0, 0, 1, 1], [], []>} : vector<128x8xbf16>, vector<8x32xbf16>, vector<128x32xf32> -> vector<128x32xf32>
    %c0_65 = arith.constant 0 : index
    %c0_66 = arith.constant 0 : index
    %91 = vector.load %arg10[%c0_65, %c0_66] : memref<1x32xf32, #tpu.memory_space<vmem>>, vector<1x32xf32>
    %92 = vector.broadcast %91 : vector<1x32xf32> to vector<128x32xf32>
    %93 = arith.addf %90, %92 : vector<128x32xf32>
    %94 = vector.shape_cast %1 : vector<8x16x32xf32> to vector<128x32xf32>
    %95 = arith.addf %93, %94 : vector<128x32xf32>
    %cst_67 = arith.constant 0.000000e+00 : f32
    %96 = vector.broadcast %cst_67 : f32 to vector<128x32xf32>
    %97 = arith.maximumf %95, %96 : vector<128x32xf32>
    %98 = vector.shape_cast %97 : vector<128x32xf32> to vector<8x16x32xf32>
    %c0_68 = arith.constant 0 : index
    %c0_69 = arith.constant 0 : index
    %c0_70 = arith.constant 0 : index
    %c0_71 = arith.constant 0 : index
    %99 = vector.load %arg11[%c0_68, %c0_69, %c0_70, %c0_71] : memref<1x8x16x32xf32, #tpu.memory_space<vmem>>, vector<1x8x16x32xf32>
    %100 = vector.shape_cast %99 : vector<1x8x16x32xf32> to vector<8x16x32xf32>
    %101 = vector.shape_cast %98 : vector<8x16x32xf32> to vector<1x8x16x32xf32>
    tpu.vector_store %arg11[%c0_68, %c0_69, %c0_70, %c0_71], %101 {strides = array<i32>} : memref<1x8x16x32xf32, #tpu.memory_space<vmem>>, vector<1x8x16x32xf32>,
    return
  }
  func.func @transform_0(%arg0: i32, %arg1: i32) -> (i32, i32, i32, i32) {
    %c0_i32 = arith.constant 0 : i32
    %c0_i32_0 = arith.constant 0 : i32
    %c0_i32_1 = arith.constant 0 : i32
    return %arg0, %arg1, %c0_i32, %c0_i32_0 : i32, i32, i32, i32
  }
  func.func @transform_1(%arg0: i32, %arg1: i32) -> (i32, i32, i32, i32) {
    %c8_i32 = arith.constant 8 : i32
    %0 = arith.muli %arg1, %c8_i32 : i32
    %c1_i32 = arith.constant 1 : i32
    %1 = arith.subi %0, %c1_i32 : i32
    %c0_i32 = arith.constant 0 : i32
    %2 = arith.maxsi %1, %c0_i32 : i32
    %c0_i32_0 = arith.constant 0 : i32
    %c0_i32_1 = arith.constant 0 : i32
    %c0_i32_2 = arith.constant 0 : i32
    return %arg0, %2, %c0_i32_0, %c0_i32_1 : i32, i32, i32, i32
  }
  func.func @transform_2(%arg0: i32, %arg1: i32) -> (i32, i32, i32, i32) {
    %c1_i32 = arith.constant 1 : i32
    %0 = arith.addi %arg1, %c1_i32 : i32
    %c8_i32 = arith.constant 8 : i32
    %1 = arith.muli %0, %c8_i32 : i32
    %c15_i32 = arith.constant 15 : i32
    %2 = arith.minsi %1, %c15_i32 : i32
    %c0_i32 = arith.constant 0 : i32
    %c0_i32_0 = arith.constant 0 : i32
    %c0_i32_1 = arith.constant 0 : i32
    return %arg0, %2, %c0_i32, %c0_i32_0 : i32, i32, i32, i32
  }
  func.func @transform_3(%arg0: i32, %arg1: i32) -> (i32, i32) {
    %c0_i32 = arith.constant 0 : i32
    %c0_i32_0 = arith.constant 0 : i32
    %c0_i32_1 = arith.constant 0 : i32
    return %c0_i32, %c0_i32_0 : i32, i32
  }
  func.func @transform_4(%arg0: i32, %arg1: i32) -> (i32, i32) {
    %c0_i32 = arith.constant 0 : i32
    %c0_i32_0 = arith.constant 0 : i32
    %c0_i32_1 = arith.constant 0 : i32
    return %c0_i32, %c0_i32_0 : i32, i32
  }
  func.func @transform_5(%arg0: i32, %arg1: i32) -> (i32, i32, i32) {
    %c0_i32 = arith.constant 0 : i32
    %c0_i32_0 = arith.constant 0 : i32
    %c0_i32_1 = arith.constant 0 : i32
    %c0_i32_2 = arith.constant 0 : i32
    return %c0_i32, %c0_i32_0, %c0_i32_1 : i32, i32, i32
  }
  func.func @transform_6(%arg0: i32, %arg1: i32) -> (i32, i32) {
    %c0_i32 = arith.constant 0 : i32
    %c0_i32_0 = arith.constant 0 : i32
    %c0_i32_1 = arith.constant 0 : i32
    return %c0_i32, %c0_i32_0 : i32, i32
  }
  func.func @transform_7(%arg0: i32, %arg1: i32) -> (i32, i32) {
    %c0_i32 = arith.constant 0 : i32
    %c0_i32_0 = arith.constant 0 : i32
    %c0_i32_1 = arith.constant 0 : i32
    return %c0_i32, %c0_i32_0 : i32, i32
  }
  func.func @transform_8(%arg0: i32, %arg1: i32) -> (i32, i32) {
    %c0_i32 = arith.constant 0 : i32
    %c0_i32_0 = arith.constant 0 : i32
    %c0_i32_1 = arith.constant 0 : i32
    return %c0_i32, %c0_i32_0 : i32, i32
  }
  func.func @transform_9(%arg0: i32, %arg1: i32) -> (i32, i32, i32, i32) {
    %c0_i32 = arith.constant 0 : i32
    %c0_i32_0 = arith.constant 0 : i32
    %c0_i32_1 = arith.constant 0 : i32
    return %arg0, %arg1, %c0_i32, %c0_i32_0 : i32, i32, i32, i32
  }
}

</mosaic_0001>

<bundles_post_ra>
// kernel: bottleneck_caffe_pallas.1
= control target key start
LH: loop header
LB: loop body
LE: loop exit
PB: predicated region body
PF: predicated region fallthrough
CT: control target
= control target key end

     0   :  { %s3911_s0 = inlined_call_operand.hbm [shape: f32[2,16,16,32], index: 0, kind: input, shape index: {}, may-alias: {0,1,2}]   ;;  %s3912_s1 = inlined_call_operand.hbm [shape: f32[2,16,16,32], index: 1, kind: input, shape index: {}, may-alias: {0,1,2}]   ;;  %s3913_s2 = inlined_call_operand.hbm [shape: f32[2,16,16,32], index: 2, kind: input, shape index: {}, may-alias: {0,1,2}]   ;;  %s3914_s3 = inlined_call_operand.vmem [shape: bf16[32,8], index: 3, kind: input, shape index: {}]   ;;  %s3915_s4 = inlined_call_operand.vmem [shape: f32[1,8], index: 4, kind: input, shape index: {}]   ;;  %s3916_s5 = inlined_call_operand.vmem [shape: bf16[3,24,8], index: 5, kind: input, shape index: {}]   ;;  %s3917_s6 = inlined_call_operand.vmem [shape: f32[1,8], index: 6, kind: input, shape index: {}]   ;;  %s3918_s7 = inlined_call_operand.vmem [shape: bf16[8,32], index: 7, kind: input, shape index: {}]   ;;  %s3919_s8 = inlined_call_operand.vmem [shape: f32[1,32], index: 8, kind: input, shape index: {}]   ;;  %s3920_s9 = inlined_call_operand.hbm [shape: f32[2,16,16,32], index: 9, kind: output, shape index: {}]  }
   0x1   :  { %3946 = sst [smem:[#allocation27_spill]] %s3911_s0 }
   0x2   :  { %3947 = sst [smem:[#allocation28_spill]] %s3912_s1 }
   0x3   :  { %3948 = sst [smem:[#allocation29_spill]] %s3914_s3 }
   0x4   :  { %3949 = sst [smem:[#allocation30_spill]] %s3915_s4 }
   0x5   :  { %3950 = sst [smem:[#allocation31_spill]] %s3916_s5 }
   0x6   :  { %3951 = sst [smem:[#allocation32_spill]] %s3917_s6 }
   0x7   :  { %3952 = sst [smem:[#allocation33_spill]] %s3918_s7 }
   0x8   :  { %3953 = sst [smem:[#allocation34_spill]] %s3919_s8 }
   0x9   :  { %3954 = sst [smem:[#allocation35_spill]] %s3920_s9 }
   0xa   :  { %14 = vsyncpa [#allocation4], 0 }
   0xb   :  { %16 = vsyncpa [#allocation4 + $0x1], 0 }
   0xc   :  { %17 = vsyncpa [#allocation7], 0 }
   0xd   :  { %19 = vsyncpa [#allocation7 + $0x1], 0 }
   0xe   :  { %20 = vsyncpa [#allocation5], 0 }
   0xf   :  { %22 = vsyncpa [#allocation5 + $0x1], 0  ;;  %s2815_s30 = smov 0   ;;  %s2817_s10 = smov 0  }
  0x10   :  { %s2819_s11 = smov 0   ;;  %s2821_s12 = smov 0  }
  0x11   :  { %s2823_s13 = smov 0   ;;  %s2825_s14 = smov 0  }
  0x12   :  { %s2827_s15 = smov 0   ;;  %s2829_s16 = smov 0  }
  0x13   :  { %s2831_s17 = smov 0   ;;  %s2833_s18 = smov 0  }
  0x14   :  { %s2835_s19 = smov 0   ;;  %s2837_s20 = smov 0  }
  0x15   :  { %s2839_s21 = smov 0   ;;  %s2841_s22 = smov 0  }
  0x16 LB: > { %3955 = sst [smem:[#allocation14_spill]] %s2726_s14  ;;  %s2886_s23 = sadd.s32 4294967295, %s2758_s22   ;;  %s2758_s22 = sphi %s2841_s22, %s28_s22   ;;  %s2754_s21 = sphi %s2839_s21, %s4018_s21   ;;  %s2750_s20 = sphi %s2837_s20, %s4017_s20   ;;  %s2746_s19 = sphi %s2835_s19, %s4016_s19   ;;  %s2742_s18 = sphi %s2833_s18, %s4015_s18   ;;  %s2738_s17 = sphi %s2831_s17, %s4014_s17   ;;  %s2734_s16 = sphi %s2829_s16, %s4026_s16   ;;  %s2730_s15 = sphi %s2827_s15, %s4025_s15   ;;  %s2726_s14 = sphi %s2825_s14, %s4012_s14   ;;  %s2722_s13 = sphi %s2823_s13, %s4024_s13   ;;  %s2718_s12 = sphi %s2821_s12, %s4023_s12   ;;  %s2714_s11 = sphi %s2819_s11, %s4022_s11   ;;  %s2710_s10 = sphi %s2817_s10, %s4021_s10   ;;  %s2706_s30 = sphi %s2815_s30, %s4020_s30  }
  0x17   : > { %3956 = sst [smem:[#allocation15_spill]] %s2730_s15  ;;  %s37_s24 = sadd.s32 1, %s2750_s20 }
  0x18   : > { %3957 = sst [smem:[#allocation16_spill]] %s2738_s17  ;;  %p38_p0 = scmp.ge.s32.totalorder %s37_s24, 2 }
  0x19   : > { %3958 = sst [smem:[#allocation17_spill]] %s2742_s18  ;;  %s40_s25 = sadd.s32 1, %s2754_s21 }
  0x1a   : > { %3959 = sst [smem:[#allocation18_spill]] %s2746_s19  ;;  %p57_p1 = scmp.eq.s32.totalorder %s2758_s22, 0 }
  0x1b   : > { %3960 = sst [smem:[#allocation19_spill]] %s2750_s20  ;;  %p63_p2 = scmp.eq.s32.totalorder %s2886_s23, 0 }
  0x1c   : > { %3961 = sst [smem:[#allocation20_spill]] %s2754_s21  ;;  %s4028_s24 = smov (%p38_p0, %s37_s24), 0 }
  0x1d   : > { %3962 = sst [smem:[#allocation21_spill]] %s4028_s24  ;;  %s4030_s25 = smov (!%p38_p0, %s40_s25), %s2754_s21 }
  0x1e   : > { %s45_s26 = ssub.s32 %s2750_s20, %s4028_s24  ;;  %s2091_s27 = sshll.u32 %s2750_s20, 3 }
  0x1f   : > { %p42_p3 = scmp.ge.s32.totalorder %s4030_s25, 2  ;;  %s2092_s28 = sadd.s32 4294967295, %s2091_s27 }
  0x20   : > { %p74_p4 = scmp.gt.s32.totalorder %s2092_s28, 0  ;;  %s2093_s29 = sshll.u32 %s4028_s24, 3 }
  0x21   : > { %s4032_s25 = smov (%p42_p3, %s4030_s25), 0  ;;  %s2094_s19 = sadd.s32 4294967295, %s2093_s29 }
  0x22   : > { %3963 = sst [smem:[#allocation22_spill]] %s4032_s25  ;;  %s4034_s28 = smov (!%p74_p4, %s2092_s28), 0 }
  0x23   : > { %s2903_s9 = ssub.s32 %s2754_s21, %s4032_s25  ;;  %p78_p5 = scmp.gt.s32.totalorder %s2094_s19, 0 }
  0x24   : > { %s2906_s8 = sor.u32 %s45_s26, %s2903_s9  ;;  %s85_s6 = sadd.s32 1, %s2726_s14 }
  0x25   : > { %p47_p6 = scmp.eq.s32.totalorder %s2906_s8, 0  ;;  %s4036_s19 = smov (!%p78_p5, %s2094_s19), 0 }
  0x26   : > { %p92_p7 = scmp.ne.s32.totalorder %s2726_s14, %s2722_s13  ;;  %p98_p8 = scmp.ne.s32.totalorder %s2722_s13, %s2718_s12 }
  0x27   : > { %s81_s24 = ssub.s32 %s4034_s28, %s4036_s19  ;;  %s2914_s25 = sadd.s32 8, %s2091_s27 }
  0x28   : > { %s82_s7 = sor.u32 %s81_s24, %s2903_s9  ;;  %p2919_p9 = por %p92_p7, %p57_p1 }
  0x29   : > { %p83_p10 = scmp.eq.s32.totalorder %s82_s7, 0  ;;  %p2925_p11 = por %p98_p8, %p63_p2 }
  0x2a   : > { %s2930_s12 = sadd.s32 8, %s2093_s29  ;;  %p3939_p0 = scmp.lt.s32.totalorder %s2758_s22, 4 }
  0x2b   : > { %s3965_s5 = scalar_select %p2925_p11, 1, 0 }
  0x2c   : > { %s2933_s19 = scalar_select %p83_p10, %s2726_s14, %s85_s6  }
  0x2d   : > { %3966 = sst [smem:[#allocation23_spill]] %s3965_s5  ;;  %s2938_s24 = sshll.u32 %s2754_s21, 5 }
  0x2e   : > { %3967 = sst [smem:[#allocation24_spill]] %s2933_s19  ;;  %s355_s7 = sand.u32 1, %s2758_s22  }
  0x2f   : > { %s357_s27 = sand.u32 1, %s2726_s14   ;;  %s2107_s4 = sshll.u32 %s4034_s28, 1 }
  0x30   : > { %s2104_s18 = sshll.u32 %s357_s27, 4  ;;  %s368_s3 = sadd.s32 %s2107_s4, %s2938_s24 }
  0x31   : > { %s359_s5 = scalar_lea.vmem [#allocation6], %s2104_s18  ;;  %s2109_s6 = sshll.u32 %s368_s3, 3 }
  0x32   : > { %s373_s29 = sshll.u32 %s359_s5, 4  ;;  %s3968_s1 = sld [smem:[#allocation28_spill]]  ;;  %s374_s29 = int_to_ptr.vmem [resolvable:$true] %s373_s29 }
  0x33   : > { %p2364_p3 = pnand %p3939_p0, %p2919_p9  ;;  %p2115_p4 = scmp.ge.s32.totalorder %s2758_s22, 1 }
  0x34   : > { %s2951_s5 = scalar_lea.sflag [#allocation7], %s355_s7  ;;  %s3932_s3 = smov 128  }
  0x35   : > { %s3934_s18 = smov 8   ;;  %p409_p5 = scmp.lt.s32.totalorder %s2758_s22, 5 }
  0x36   : > { %s49_s28 = sadd.s32 1, %s2738_s17  ;;  %p56_p8 = scmp.ne.s32.totalorder %s2738_s17, %s2734_s16 }
  0x37   : > { %p2958_p7 = pnand %p2115_p4, %p409_p5  ;;  %p62_p9 = scmp.ne.s32.totalorder %s2734_s16, %s2730_s15 }
  0x38   : > { %s370_s14 = scalar_lea.hbm %s3968_s1, %s2109_s6  ;;  %p286_p10 = scmp.eq.s32.totalorder %s2886_s23, 3 }
  0x39   : > { %s371_s4 = sshll.u32 %s370_s14, 4  ;;  %s2090_s14 = sadd.s32 4294967294, %s2758_s22   ;;  %s372_s4 = int_to_ptr.hbm [resolvable:$true] %s371_s4 }
  0x3a   : > { %2366 = dma.hbm_to_vmem [thread:$0]  (!%p2364_p3), %s372_s4, 256, %s374_s29, %s2951_s5, %s3932_s3, %s3932_s3, %s3934_s18  }
  0x3b   : > { %s2967_s26 = scalar_select %p47_p6, %s2738_s17, %s49_s28  }
  0x3c   : > { %p292_p13 = scmp.eq.s32.totalorder %s2090_s14, 3  ;;  %p2976_p12 = por %p57_p1, %p56_p8 }
  0x3d   : > { %3970 = sst [smem:[#allocation25_spill]] %s2967_s26  ;;  %p2982_p3 = por %p63_p2, %p62_p9 }
  0x3e   : > { %p2986_p4 = por %p286_p10, %p56_p8  ;;  %p2990_p6 = por %p292_p13, %p62_p9 }
  0x3f   : > { %s330_s29 = sand.u32 1, %s2738_s17   ;;  %s2311_s6 = sshll.u32 %s2750_s20, 4 }
  0x40   : > { %s3974_s27 = scalar_select %p2990_p6, 1, 0 }
  0x41   : > { %s2099_s4 = sshll.u32 %s330_s29, 7  ;;  %s340_s14 = sadd.s32 %s2311_s6, %s2938_s24 }
  0x42   : > { %3975 = sst [smem:[#allocation26_spill]] %s3974_s27  ;;  %s2103_s28 = sshll.u32 %s340_s14, 3 }
  0x43   : > { %s334_s3 = scalar_lea.vmem [#allocation3], %s2099_s4  ;;  %s3976_s0 = sld [smem:[#allocation27_spill]] }
  0x44   : > { %s345_s18 = sshll.u32 %s334_s3, 4  ;;  %p2361_p13 = pnand %p3939_p0, %p2976_p12  ;;  %s346_s18 = int_to_ptr.vmem [resolvable:$true] %s345_s18 }
  0x45   : > { %s331_s6 = scalar_lea.sflag [#allocation4], %s330_s29  ;;  %s3977_s20 = smov 8  }
  0x46   : > { %s3978_s14 = smov 128   ;;  %p3979_p5 = scmp.lt.s32.totalorder %s2914_s25, 15 }
  0x47   : > { %p3980_p8 = scmp.lt.s32.totalorder %s2930_s12, 15  ;;  %s121_s1 = sadd.s32 1, %s2714_s11 }
  0x48   : > { %s4038_s25 = smov (!%p3979_p5, %s2914_s25), 15  ;;  %p128_p9 = scmp.ne.s32.totalorder %s2714_s11, %s2710_s10 }
  0x49   : > { %s342_s27 = scalar_lea.hbm %s3976_s0, %s2103_s28  ;;  %s4040_s12 = smov (!%p3980_p8, %s2930_s12), 15 }
  0x4a   : > { %s343_s17 = sshll.u32 %s342_s27, 4  ;;  %s117_s3 = ssub.s32 %s4038_s25, %s4040_s12  ;;  %s344_s17 = int_to_ptr.hbm [resolvable:$true] %s343_s17 }
  0x4b   : > { %2363 = dma.hbm_to_vmem [thread:$0]  (!%p2361_p13), %s344_s17, 2048, %s346_s18, %s331_s6, %s3978_s14, %s3978_s14, %s3977_s20  }
  0x4c   : > { %p134_p10 = scmp.ne.s32.totalorder %s2710_s10, %s2706_s30  ;;  %s118_s26 = sor.u32 %s117_s3, %s2903_s9 }
  0x4d   : > { %p3021_p12 = por %p128_p9, %p57_p1  ;;  %p119_p0 = scmp.eq.s32.totalorder %s118_s26, 0 }
  0x4e   : > { %p3027_p13 = por %p134_p10, %p63_p2  ;;  %s385_s18 = sand.u32 1, %s2714_s11  }
  0x4f   : > { %s2112_s27 = sshll.u32 %s4038_s25, 1  ;;  %s2110_s30 = sshll.u32 %s385_s18, 4 }
  0x50   : > { %s3033_s29 = scalar_select %p119_p0, %s2714_s11, %s121_s1  }
  0x51   : > { %s396_s9 = sadd.s32 %s2112_s27, %s2938_s24  ;;  %s387_s3 = scalar_lea.vmem [#allocation8], %s2110_s30 }
  0x52   : > { %s2114_s12 = sshll.u32 %s396_s9, 3  ;;  %s401_s0 = sshll.u32 %s387_s3, 4  ;;  %s402_s0 = int_to_ptr.vmem [resolvable:$true] %s401_s0 }
  0x53   : > { %s398_s6 = scalar_lea.hbm %s3913_s2, %s2114_s12  ;;  %p3983_p1 = scmp.lt.s32.totalorder %s2758_s22, 4 }
  0x54   : > { %s399_s15 = sshll.u32 %s398_s6, 4  ;;  %413 = sbr.rel (%p2958_p7) target bundleno = 804 (0x324), region = 56  ;;  %s400_s15 = int_to_ptr.hbm [resolvable:$true] %s399_s15 }
  0x55   : > { %p2367_p2 = pnand %p3983_p1, %p3021_p12  ;;  %s3050_s25 = sand.u32 (!%p2958_p7), 1, %s2734_s16  }
  0x56   : > { %s2116_s24 = sshll.u32 (!%p2958_p7), %s3050_s25, 7  ;;  %s416_s1 = scalar_lea.sflag (!%p2958_p7), [#allocation4], %s3050_s25 }
  0x57   : > { %2369 = dma.hbm_to_vmem [thread:$0]  (!%p2367_p2), %s400_s15, 256, %s402_s0, %s2951_s5, %s3978_s14, %s3978_s14, %s3977_s20  }
  0x58   : > { %s3056_s26 = scalar_lea.vmem (!%p2958_p7), [#allocation3], %s2116_s24 }
  0x59   : > { %2689 = dma.done.wait (%p2982_p3), %s416_s1, 2048  }
  0x5a   : > { %2691 = vsyncadd (%p2982_p3), %s416_s1, 4294965248  ;;  %s425_s15 = sand.u32 1, %s2886_s23   ;;  %s427_s20 = sand.u32 1, %s2722_s13  }
  0x5b   : > { %s3064_s5 = sshll.u32 %s427_s20, 4  ;;  %s426_s21 = scalar_lea.sflag [#allocation7], %s425_s15 }
  0x5c   : > { %s429_s14 = scalar_lea.vmem [#allocation6], %s3064_s5 }
  0x5d   : > { %2693 = dma.done.wait (%p2925_p11), %s426_s21, 256  }
  0x5e   : > { %2695 = vsyncadd (%p2925_p11), %s426_s21, 4294967040  ;;  %s437_s19 = sand.u32 1, %s2710_s10  }
  0x5f   : > { %s3072_s7 = sshll.u32 %s437_s19, 4 }
  0x60   : > { %s439_s18 = scalar_lea.vmem [#allocation8], %s3072_s7 }
  0x61   : > { %2697 = dma.done.wait (%p3027_p13), %s426_s21, 256  }
  0x62   : > { %2699 = vsyncadd (%p3027_p13), %s426_s21, 4294967040  ;;  %s3985_s30 = sld [smem:[#allocation29_spill]]  ;;  %v496_v2 = vld [vmem:[%s3056_s26] sm:$0xff]  ;;  %v497_v3 = vld [vmem:[%s3056_s26 + $0x8] sm:$0xff]  ;;  %vm540_vm0 = vcmask 261120   ;;  %vm647_vm1 = vcmask 60416  }
  0x63   : > { %v502_v4 = vld [vmem:[%s3056_s26 + $0x30] sm:$0xff]  ;;  %v503_v5 = vld [vmem:[%s3056_s26 + $0x38] sm:$0xff]  ;;  %v512_v7 = vpack.c.bf16 %v497_v3, %v496_v2  ;;  %v504_v20 = vld [vmem:[%s3056_s26 + $0x40] sm:$0xff]  ;;  %s3987_s7 = sld [smem:[#allocation30_spill]]  ;;  %vm924_vm2 = vcmask 1047552   ;;  %vm1290_vm6 = vcmask 1043456  }
  0x64   : > { %v515_v8 = vpack.c.bf16 %v503_v5, %v502_v4  ;;  %v506_v10 = vld [vmem:[%s3056_s26 + $0x50] sm:$0xff]  ;;  %v507_v11 = vld [vmem:[%s3056_s26 + $0x58] sm:$0xff]  ;;  %v505_v21 = vld [vmem:[%s3056_s26 + $0x48] sm:$0xff]  ;;  %s3988_s5 = sld [smem:[#allocation17_spill]]  ;;  %vm925_vm3 = vsmask.f32 7424 }
  0x65   : > { %v517_v12 = vpack.c.bf16 %v507_v11, %v506_v10  ;;  %v716_v15 = vld [vmem:[%s439_s18] sm:$0xff]  ;;  %v717_v16 = vld [vmem:[%s439_s18 + $0x8] sm:$0xff]  ;;  %v516_v23 = vpack.c.bf16 %v505_v21, %v504_v20  ;;  %vm3164_vm4 = vmand %vm924_vm2, %vm925_vm3  ;;  %s3993_s28 = sld [smem:[#allocation31_spill]]  ;;  %vm889_vm8 = vcmask 1040384   ;;  %vm890_vm9 = vsmask.f32 256 }
  0x66   : > { %v498_v17 = vld [vmem:[%s3056_s26 + $0x10] sm:$0xff]  ;;  %v718_v18 = vpack.c.bf16 %v717_v16, %v716_v15  ;;  %v499_v19 = vld [vmem:[%s3056_s26 + $0x18] sm:$0xff]  ;;  %v508_v24 = vld [vmem:[%s3056_s26 + $0x60] sm:$0xff]  ;;  %vm975_vm11 = vcmask 64512   ;;  %vm1000_vm12 = vcmask 130048   ;;  %vm1273_vm13 = vcmask 195584  }
  0x67   : > { %v513_v22 = vpack.c.bf16 %v499_v19, %v498_v17  ;;  %v509_v25 = vld [vmem:[%s3056_s26 + $0x68] sm:$0xff]  ;;  %v500_v27 = vld [vmem:[%s3056_s26 + $0x20] sm:$0xff]  ;;  %v510_v33 = vld [vmem:[%s3056_s26 + $0x70] sm:$0xff]  ;;  %s4003_s17 = sld [smem:[#allocation33_spill]]  ;;  %s3777_s21 = scalar_lea.vmem [#allocation9], %s2116_s24 }
  0x68   : > { %s3986_s9 = smov %s3985_s30  ;;  %v2315_v0 = vld [vmem:[%s3985_s30 + $0x8] sm:$0xff]  ;;  %v518_v26 = vpack.c.bf16 %v509_v25, %v508_v24  ;;  %v501_v28 = vld [vmem:[%s3056_s26 + $0x28] sm:$0xff]  ;;  %v664_v29 = vld [vmem:[%s429_s14] sm:$0xff]  ;;  %s2763_s30 = smov 16  }
  0x69   : > { %v2314_v1 = vld [vmem:[%s3986_s9] sm:$0xff]  ;;  %571 = vmatpush.bf16.msra.mxu0 %v2315_v0  ;;  %2348 = vmatpush.bf16.msra.mxu1 %v2315_v0  ;;  %v2317_v6 = vld [vmem:[%s3986_s9 + $0x8] sm:$0xff]  ;;  %v514_v31 = vpack.c.bf16 %v501_v28, %v500_v27  ;;  %vm3547_vm10 = vmand %vm889_vm8, %vm890_vm9  ;;  %s4004_s1 = sld [smem:[#allocation32_spill]]  ;;  %s1932_s3 = scalar_lea.sflag [#allocation5], %s3050_s25 }
  0x6a   : > { %2349 = vmatpush.bf16.msra.mxu3 %v2315_v0  ;;  %v2316_v9 = vld [vmem:[%s3986_s9] sm:$0xff]  ;;  %v2319_v13 = vld [vmem:[%s3986_s9 + $0x8] sm:$0xff]  ;;  %p708_p11 = scmp.gt.s32.totalorder %s3988_s5, 0  ;;  %p760_p0 = scmp.lt.s32.totalorder %s3988_s5, 1 }
  0x6b   : > { %748 = vmatpush.bf16.msra.mxu2 %v2319_v13  ;;  %v2318_v14 = vld [vmem:[%s3986_s9] sm:$0xff]  ;;  %v665_v30 = vld [vmem:[%s429_s14 + $0x8] sm:$0xff]  ;;  %s2762_s14 = smov 8   ;;  %s4005_s20 = sld [smem:[#allocation34_spill]] }
  0x6c   : > { %v666_v32 = vpack.c.bf16 %v665_v30, %v664_v29  ;;  %v511_v34 = vld [vmem:[%s3056_s26 + $0x78] sm:$0xff]  ;;  %v3134_v36 = vld [vmem:[%s3987_s7] ss:$0 sm:$0xff]  ;;  %s709_s27 = scalar_select %p708_p11, 1, 0 }
  0x6d   : > { %572 = vmatpush.bf16.msra.mxu0 %v2314_v1  ;;  %2350 = vmatpush.bf16.msra.mxu1 %v2314_v1  ;;  %v519_v35 = vpack.c.bf16 %v511_v34, %v510_v33  ;;  %v2494_v21 = vld [vmem:[%s3987_s7] ss:$0 sm:$0xff]  ;;  %s761_s12 = scalar_select %p760_p0, 1, 0 }
  0x6e   : > { %2351 = vmatpush.bf16.msra.mxu3 %v2314_v1  ;;  %s4006_s24 = sld [smem:[#allocation18_spill]]  ;;  %s2347_s19 = sshll.u32 %s3988_s5, 4 }
  0x6f   : > { %749 = vmatpush.bf16.msra.mxu2 %v2318_v14  ;;  %s4007_s4 = sld [smem:[#allocation35_spill]] }
  0x70   : > { %2128 = vmatmul.msk.bf16.vlgmr.msra.gmra.mxu0 %vm540_vm0, %v512_v7  ;;  %2131 = vmatmul.msk.bf16.vlgmr.msra.gmra.mxu1 %vm540_vm0, %v515_v8 }
  0x71   : > { %696 = vmatpush.bf16.msrb.mxu1 %v2317_v6  ;;  %2133 = vmatmul.msk.bf16.vlgmr.msra.gmra.mxu3 %vm540_vm0, %v517_v12 }
  0x72   : > { %2153 = vmatmul.msk.bf16.vlgmr.msra.gmra.mxu2 %vm540_vm0, %v718_v18 }
  0x74   : > { %s2303_s18 = sshll.u32 %s4006_s24, 5 }
  0x75   : > { %697 = vmatpush.bf16.msrb.mxu1 %v2316_v9  ;;  %s1944_s23 = sadd.s32 %s2347_s19, %s2303_s18  ;;  %s2624_s24 = scalar_lea.hbm %s4007_s4, 512 }
  0x80   : > { %2129 = vmatmul.msk.bf16.gmra.mxu0 %vm540_vm0, %v513_v22  ;;  %2132 = vmatmul.msk.bf16.gmra.mxu1 %vm540_vm0, %v516_v23 }
  0x81   : > { %2134 = vmatmul.msk.bf16.gmra.mxu3 %vm540_vm0, %v518_v26 }
  0x90   : > { %2130 = vmatmul.msk.bf16.gmra.mxu0 %vm540_vm0, %v514_v31  ;;  %2144 = vmatmul.msk.bf16.vlgmr.msrb.gmra.mxu1 %vm540_vm0, %v666_v32 }
  0x91   : > { %2135 = vmatmul.msk.bf16.gmra.mxu3 %vm540_vm0, %v519_v35  ;;  %v710_v35 = vstv %s709_s27  ;;  %s2304_s27 = sshll.u32 %s1944_s23, 3 }
  0x92   : > { %vm3208_vm5 = vcmp.eq.s32.totalorder %v710_v35, 1  ;;  %s1946_s5 = scalar_lea.hbm %s4007_s4, %s2304_s27 }
  0x93   : > { %s1949_s6 = sshll.u32 %s1946_s5, 4  ;;  %s1950_s6 = int_to_ptr.hbm [resolvable:$true] %s1949_s6 }
  0xed   : > { %v574_v37 = vpop.f32.mrf.mxu0  ;;  %v589_v38 = vpop.f32.mrf.mxu1 }
  0xee   : > { %v575_v39 = vadd.f32 %v3134_v36, %v574_v37  ;;  %v590_v40 = vadd.f32 %v3134_v36, %v589_v38 }
  0xf0   : > { %v614_v41 = vmax.f32 %v575_v39, 0.0  ;;  %v620_v42 = vmax.f32 %v590_v40, 0.0 }
  0xf2   : > { %v630_v43 = vpack.c.bf16 %v614_v41, %v614_v41  ;;  %v636_v44 = vpack.c.bf16 %v620_v42, %v620_v42 }
  0xf4   : > { %648 = vst.msk [vmem:[#allocation2 + $0x8] sm:$0xf] %vm647_vm1, %v630_v43  ;;  %v599_v37 = vpop.f32.mrf.mxu3 }
  0xf5   : > { %654 = vst.msk [vmem:[#allocation2 + $0x20] sm:$0xf] %vm647_vm1, %v636_v44  ;;  %v576_v45 = vpop.f32.mrf.mxu0  ;;  %v591_v46 = vpop.f32.mrf.mxu1  ;;  %v600_v39 = vadd.f32 %v3134_v36, %v599_v37 }
  0xf6   : > { %v577_v47 = vadd.f32 %v3134_v36, %v576_v45  ;;  %v592_v48 = vadd.f32 %v3134_v36, %v591_v46 }
  0xf7   : > { %v624_v45 = vmax.f32 %v600_v39, 0.0 }
  0xf8   : > { %v615_v49 = vmax.f32 %v577_v47, 0.0  ;;  %v621_v50 = vmax.f32 %v592_v48, 0.0 }
  0xfa   : > { %v631_v51 = vpack.c.bf16 %v615_v49, %v615_v49  ;;  %v637_v52 = vpack.c.bf16 %v621_v50, %v621_v50 }
  0xfc   : > { %649 = vst.msk [vmem:[#allocation2 + $0xc] sm:$0xf] %vm647_vm1, %v631_v51  ;;  %v640_v51 = vpack.c.bf16 %v624_v45, %v624_v45 }
  0xfd   : > { %655 = vst.msk [vmem:[#allocation2 + $0x24] sm:$0xf] %vm647_vm1, %v637_v52  ;;  %v579_v53 = vpop.f32.mrf.mxu0  ;;  %v594_v54 = vpop.f32.mrf.mxu1 }
  0xfe   : > { %v580_v55 = vadd.f32 %v3134_v36, %v579_v53  ;;  %v595_v56 = vadd.f32 %v3134_v36, %v594_v54  ;;  %658 = vst.msk [vmem:[#allocation2 + $0x30] sm:$0xf] %vm647_vm1, %v640_v51 }
 0x100   : > { %v616_v57 = vmax.f32 %v580_v55, 0.0  ;;  %v622_v58 = vmax.f32 %v595_v56, 0.0 }
 0x102   : > { %v632_v59 = vpack.c.bf16 %v616_v57, %v616_v57  ;;  %v638_v60 = vpack.c.bf16 %v622_v58, %v622_v58 }
 0x103   : > { %v2329_v61 = vld [vmem:[#allocation2 + $0x8] sm:$0xff] }
 0x104   : > { %v3146_v62 = vld [vmem:[#allocation2 + $0x8] sm:$0xff]  ;;  %650 = vst.msk [vmem:[#allocation2 + $0x10] sm:$0xf] %vm647_vm1, %v632_v59  ;;  %v3149_v63 = vld [vmem:[#allocation2 + $0x20] sm:$0xff]  ;;  %1180 = vrot.lane.b32.xlu0 %v2329_v61, %s2762_s14  ;;  %v1077_v2 = vshrl.u32 %v2329_v61, 16  ;;  %v1080_v3 = vshll.u32 %v2329_v61, 16 }
 0x105   : > { %656 = vst.msk [vmem:[#allocation2 + $0x28] sm:$0xf] %vm647_vm1, %v638_v60  ;;  %v581_v0 = vpop.f32.mrf.mxu0  ;;  %v596_v1 = vpop.f32.mrf.mxu1  ;;  %v833_v4 = vshrl.u32 %v3146_v62, 16  ;;  %v3154_v5 = vld [vmem:[#allocation2 + $0x20] sm:$0xff]  ;;  %v1492_v8 = vshrl.u32 %v3149_v63, 16  ;;  %v1495_v24 = vshll.u32 %v3149_v63, 16 }
 0x106   : > { %v582_v6 = vadd.f32 %v3134_v36, %v581_v0  ;;  %v597_v7 = vadd.f32 %v3134_v36, %v596_v1  ;;  %v3160_v9 = vld [vmem:[#allocation2 + $0x20] sm:$0xff]  ;;  %v1148_v10 = vrot.slane %v1080_v3, 1  ;;  %v1079_v14 = vrot.slane %v1077_v2, 7  ;;  %v601_v0 = vpop.f32.mrf.mxu3 }
 0x107   : > { %v1494_v16 = vrot.slane %v1492_v8, 7  ;;  %v835_v17 = vrot.slane %v833_v4, 7  ;;  %v1098_v18 = vshrl.u32 %v3154_v5, 16  ;;  %v854_v22 = vshrl.u32 %v3160_v9, 16 }
 0x108   : > { %v617_v11 = vmax.f32 %v582_v6, 0.0  ;;  %v623_v12 = vmax.f32 %v597_v7, 0.0  ;;  %v1149_v15 = vor.u32 %v1148_v10, %v1077_v2  ;;  %v836_v25 = vshll.u32 %v3146_v62, 16 }
 0x109   : > { %v1100_v26 = vrot.slane %v1098_v18, 7  ;;  %v3186_v27 = vor.u32 %v1080_v3, %v1079_v14  ;;  %v856_v30 = vrot.slane %v854_v22, 7  ;;  %v3198_v32 = vor.u32 %v1495_v24, %v1494_v16 }
 0x10a   : > { %v633_v19 = vpack.c.bf16 %v617_v11, %v617_v11  ;;  %v639_v20 = vpack.c.bf16 %v623_v12, %v623_v12  ;;  %v1172_v23 = vsel %vm3164_vm4, %v1149_v15, 0  ;;  %v3194_v31 = vor.u32 %v836_v25, %v835_v17 }
 0x10b   : > { %v1101_v38 = vshll.u32 %v3154_v5, 16  ;;  %v857_v40 = vshll.u32 %v3160_v9, 16  ;;  %v602_v7 = vadd.f32 %v3134_v36, %v601_v0 }
 0x10c   : > { %651 = vst.msk [vmem:[#allocation2 + $0x14] sm:$0xf] %vm647_vm1, %v633_v19  ;;  %1204 = vrot.lane.b32.xlu0 %v1172_v23, %s2763_s30 }
 0x10d   : > { %657 = vst.msk [vmem:[#allocation2 + $0x2c] sm:$0xf] %vm647_vm1, %v639_v20  ;;  %v584_v28 = vpop.f32.mrf.mxu0  ;;  %v699_v29 = vpop.f32.mrf.mxu1  ;;  %v3206_v43 = vor.u32 %v1101_v38, %v1100_v26  ;;  %v3214_v46 = vor.u32 %v857_v40, %v856_v30 }
 0x10e   : > { %v585_v33 = vadd.f32 %v3134_v36, %v584_v28  ;;  %v700_v34 = vadd.f32 %v2494_v21, %v699_v29  ;;  %v604_v37 = vpop.f32.mrf.mxu3 }
 0x10f   : > { %v605_v45 = vadd.f32 %v3134_v36, %v604_v37 }
 0x110   : > { %v618_v41 = vmax.f32 %v585_v33, 0.0  ;;  %v704_v42 = vmax.f32 %v700_v34, 0.0 }
 0x112   : > { %v634_v47 = vpack.c.bf16 %v618_v41, %v618_v41  ;;  %v706_v48 = vpack.c.bf16 %v704_v42, %v704_v42 }
 0x113   : > { %v2338_v49 = vld [vmem:[#allocation2 + $0x10] sm:$0xff] }
 0x114   : > { %v2330_v50 = vld [vmem:[#allocation2 + $0x10] sm:$0xff]  ;;  %652 = vst.msk [vmem:[#allocation2 + $0x18] sm:$0xf] %vm647_vm1, %v634_v47  ;;  %v712_v52 = vsel %vm3208_vm5, %v706_v48, 0  ;;  %1581 = vrot.lane.b32.xlu1 %v2338_v49, %s2762_s14  ;;  %v1478_v55 = vshrl.u32 %v2338_v49, 16  ;;  %v1481_v56 = vshll.u32 %v2338_v49, 16 }
 0x115   : > { %714 = vst.msk [vmem:[#allocation2] sm:$0xf] %vm647_vm1, %v712_v52  ;;  %v586_v53 = vpop.f32.mrf.mxu0  ;;  %v701_v54 = vpop.f32.mrf.mxu1  ;;  %1182 = vrot.lane.b32.xlu0 %v2330_v50, %s2762_s14  ;;  %v3222_v57 = vld [vmem:[#allocation2 + $0x10] sm:$0xff]  ;;  %v3224_v58 = vld [vmem:[#allocation2 + $0x28] sm:$0xff]  ;;  %v1084_v61 = vshrl.u32 %v2330_v50, 16  ;;  %v1087_v2 = vshll.u32 %v2330_v50, 16 }
 0x116   : > { %v587_v59 = vadd.f32 %v3134_v36, %v586_v53  ;;  %v702_v60 = vadd.f32 %v2494_v21, %v701_v54  ;;  %v1549_v1 = vrot.slane %v1481_v56, 1  ;;  %v3229_v10 = vld [vmem:[#allocation2 + $0x28] sm:$0xff]  ;;  %v1480_v12 = vrot.slane %v1478_v55, 7 }
 0x117   : > { %v1499_v14 = vshrl.u32 %v3224_v58, 16  ;;  %v840_v15 = vshrl.u32 %v3222_v57, 16  ;;  %v3233_v16 = vld [vmem:[#allocation2 + $0x28] sm:$0xff]  ;;  %v1086_v20 = vrot.slane %v1084_v61, 7  ;;  %v625_v21 = vmax.f32 %v602_v7, 0.0 }
 0x118   : > { %v619_v3 = vmax.f32 %v587_v59, 0.0  ;;  %v705_v6 = vmax.f32 %v702_v60, 0.0  ;;  %v1550_v11 = vor.u32 %v1549_v1, %v1478_v55  ;;  %v1150_v26 = vrot.slane %v1087_v2, 1 }
 0x119   : > { %v641_v29 = vpack.c.bf16 %v625_v21, %v625_v21  ;;  %v842_v30 = vrot.slane %v840_v15, 7  ;;  %v1105_v33 = vshrl.u32 %v3229_v10, 16  ;;  %v1501_v34 = vrot.slane %v1499_v14, 7 }
 0x11a   : > { %v635_v17 = vpack.c.bf16 %v619_v3, %v619_v3  ;;  %v707_v19 = vpack.c.bf16 %v705_v6, %v705_v6  ;;  %v1573_v23 = vsel %vm3164_vm4, %v1550_v11, 0  ;;  %v3943_v35 = vshrl.u32 %v3233_v16, 16 }
 0x11b   : > { %659 = vst.msk [vmem:[#allocation2 + $0x34] sm:$0xf] %vm647_vm1, %v641_v29  ;;  %v843_v39 = vshll.u32 %v3222_v57, 16  ;;  %v1107_v41 = vrot.slane %v1105_v33, 7  ;;  %v3252_v42 = vor.u32 %v1481_v56, %v1480_v12  ;;  %v3254_v44 = vor.u32 %v1087_v2, %v1086_v20 }
 0x11c   : > { %653 = vst.msk [vmem:[#allocation2 + $0x1c] sm:$0xf] %vm647_vm1, %v635_v17  ;;  %v713_v28 = vsel %vm3208_vm5, %v707_v19, 0  ;;  %1605 = vrot.lane.b32.xlu1 %v1573_v23, %s2763_s30  ;;  %v1502_v47 = vshll.u32 %v3224_v58, 16  ;;  %v863_v48 = vrot.slane %v3943_v35, 7  ;;  %v1151_v49 = vor.u32 %v1150_v26, %v1084_v61  ;;  %v606_v17 = vpop.f32.mrf.mxu3 }
 0x11d   : > { %715 = vst.msk [vmem:[#allocation2 + $0x4] sm:$0xf] %vm647_vm1, %v713_v28  ;;  %v1108_v50 = vshll.u32 %v3229_v10, 16  ;;  %v3944_v51 = vshll.u32 %v3233_v16, 16  ;;  %v3264_v52 = vor.u32 %v843_v39, %v842_v30  ;;  %v626_v53 = vmax.f32 %v605_v45, 0.0 }
 0x11e   : > { %v3268_v54 = vor.u32 %v1502_v47, %v1501_v34  ;;  %v1173_v1 = vsel %vm3164_vm4, %v1151_v49, 0  ;;  %v607_v30 = vadd.f32 %v3134_v36, %v606_v17 }
 0x11f   : > { %v3272_v55 = vor.u32 %v1108_v50, %v1107_v41  ;;  %v3276_v56 = vor.u32 %v3944_v51, %v863_v48  ;;  %v642_v61 = vpack.c.bf16 %v626_v53, %v626_v53 }
 0x120   : > { %v627_v48 = vmax.f32 %v607_v30, 0.0 }
 0x121   : > { %660 = vst.msk [vmem:[#allocation2 + $0x38] sm:$0xf] %vm647_vm1, %v642_v61 }
 0x122   : > { %v643_v17 = vpack.c.bf16 %v627_v48, %v627_v48  ;;  %v902_v48 = vrot.slane %v836_v25, 1 }
 0x123   : > { %v2339_v59 = vld [vmem:[#allocation2 + $0x18] sm:$0xff] }
 0x124   : > { %v2331_v60 = vld [vmem:[#allocation2 + $0x18] sm:$0xff]  ;;  %v2320_v2 = vld [vmem:[#allocation2] sm:$0xff]  ;;  %1206 = vrot.lane.b32.xlu1 %v1173_v1, %s2763_s30  ;;  %v1485_v3 = vshrl.u32 %v2339_v59, 16  ;;  %v1488_v6 = vshll.u32 %v2339_v59, 16  ;;  %661 = vst.msk [vmem:[#allocation2 + $0x3c] sm:$0xf] %vm647_vm1, %v643_v17 }
 0x125   : > { %v3278_v0 = vld [vmem:[#allocation2 + $0x18] sm:$0xff]  ;;  %v1091_v7 = vshrl.u32 %v2331_v60, 16  ;;  %935 = vrot.lane.b32.xlu2 %v2320_v2, %s2762_s14  ;;  %v826_v11 = vshrl.u32 %v2320_v2, 16  ;;  %v829_v12 = vshll.u32 %v2320_v2, 16  ;;  %v1094_v29 = vshll.u32 %v2331_v60, 16 }
 0x126   : > { %v847_v19 = vshrl.u32 %v3278_v0, 16  ;;  %v1487_v20 = vrot.slane %v1485_v3, 7  ;;  %v1551_v21 = vrot.slane %v1488_v6, 1  ;;  %v850_v1 = vshll.u32 %v3278_v0, 16 }
 0x127   : > { %v1093_v23 = vrot.slane %v1091_v7, 7  ;;  %v900_v26 = vrot.slane %v829_v12, 1  ;;  %v828_v28 = vrot.slane %v826_v11, 7 }
 0x128   : > { %v1552_v34 = vor.u32 %v1551_v21, %v1485_v3  ;;  %v849_v37 = vrot.slane %v847_v19, 7  ;;  %v3289_v41 = vor.u32 %v1488_v6, %v1487_v20  ;;  %v1152_v3 = vrot.slane %v1094_v29, 1 }
 0x129   : > { %v901_v45 = vor.u32 %v900_v26, %v826_v11  ;;  %v3291_v49 = vor.u32 %v829_v12, %v828_v28  ;;  %v3293_v53 = vor.u32 %v1094_v29, %v1093_v23  ;;  %v609_v11 = vpop.f32.mrf.mxu3  ;;  %v3310_v23 = vld [vmem:[#allocation2 + $0x30] sm:$0xff]  ;;  %v1553_v29 = vrot.slane %v1495_v24, 1 }
 0x12a   : > { %v1574_v61 = vsel %vm3164_vm4, %v1552_v34, 0  ;;  %v3305_v6 = vor.u32 %v850_v1, %v849_v37  ;;  %v610_v12 = vadd.f32 %v3134_v36, %v609_v11  ;;  %v1153_v20 = vor.u32 %v1152_v3, %v1091_v7  ;;  %v3312_v26 = vld [vmem:[#allocation2 + $0x30] sm:$0xff] }
 0x12b   : > { %1607 = vrot.lane.b32.xlu0 %v1574_v61, %s2763_s30  ;;  %v927_v2 = vsel %vm3164_vm4, %v901_v45, 0  ;;  %v3314_v28 = vld [vmem:[#allocation2 + $0x30] sm:$0xff]  ;;  %v1506_v34 = vshrl.u32 %v3310_v23, 16  ;;  %v1112_v37 = vshrl.u32 %v3312_v26, 16  ;;  %v1509_v61 = vshll.u32 %v3310_v23, 16 }
 0x12c   : > { %937 = vrot.lane.b32.xlu1 %v3146_v62, %s2762_s14  ;;  %v628_v21 = vmax.f32 %v610_v12, 0.0  ;;  %v1174_v7 = vsel %vm3164_vm4, %v1153_v20, 0  ;;  %v3941_v45 = vshrl.u32 %v3314_v28, 16  ;;  %v1115_v3 = vshll.u32 %v3312_v26, 16  ;;  %v2220_v62 = vld [vmem:[%s3993_s28 + $0x14] sm:$0xf] }
 0x12d   : > { %959 = vrot.lane.b32.xlu2 %v927_v2, %s2763_s30  ;;  %v1508_v24 = vrot.slane %v1506_v34, 7  ;;  %v3942_v25 = vshll.u32 %v3314_v28, 16  ;;  %v1554_v11 = vor.u32 %v1553_v29, %v1492_v8  ;;  %v1154_v29 = vrot.slane %v1101_v38, 1  ;;  %v751_v38 = vpop.f32.mrf.mxu2 }
 0x12e   : > { %v644_v30 = vpack.c.bf16 %v628_v21, %v628_v21  ;;  %v870_v17 = vrot.slane %v3941_v45, 7 }
 0x12f   : > { %v3343_v20 = vor.u32 %v1509_v61, %v1508_v24 }
 0x130   : > { %662 = vst.msk [vmem:[#allocation2 + $0x40] sm:$0xf] %vm647_vm1, %v644_v30  ;;  %v3352_v21 = vor.u32 %v3942_v25, %v870_v17  ;;  %v903_v30 = vor.u32 %v902_v48, %v833_v4  ;;  %v2495_v4 = vld [vmem:[%s3987_s7] ss:$0 sm:$0xff]  ;;  %v1269_v48 = vunpack.c.l.b16 %v2220_v62  ;;  %v762_v17 = vstv %s761_s12 }
 0x131   : > { %v611_v2 = vpop.f32.mrf.mxu3  ;;  %vm3384_vm7 = vcmp.eq.s32.totalorder %v762_v17, 1 }
 0x132   : > { %v612_v12 = vadd.f32 %v3134_v36, %v611_v2  ;;  %v1575_v36 = vsel %vm3164_vm4, %v1554_v11, 0  ;;  %v928_v24 = vsel %vm3164_vm4, %v903_v30, 0  ;;  %v752_v2 = vadd.f32 %v2495_v4, %v751_v38  ;;  %v3377_v30 = vld [vmem:[#allocation2 + $0x38] sm:$0xff] }
 0x133   : > { %1184 = vrot.lane.b32.xlu0 %v2331_v60, %s2762_s14  ;;  %v1114_v60 = vrot.slane %v1112_v37, 7  ;;  %v1271_v11 = vpack.c.b16 %v1269_v48, %v1269_v48 }
 0x134   : > { %1208 = vrot.lane.b32.xlu1 %v1174_v7, %s2763_s30  ;;  %v629_v7 = vmax.f32 %v612_v12, 0.0  ;;  %v3375_v12 = vld [vmem:[#allocation2 + $0x38] sm:$0xff] }
 0x135   : > { %1583 = vrot.lane.b32.xlu2 %v2339_v59, %s2762_s14  ;;  %v3348_v59 = vor.u32 %v1115_v3, %v1114_v60  ;;  %v1155_v60 = vor.u32 %v1154_v29, %v1098_v18  ;;  %v1513_v18 = vshrl.u32 %v3375_v12, 16  ;;  %v1119_v29 = vshrl.u32 %v3377_v30, 16 }
 0x136   : > { %v645_v8 = vpack.c.bf16 %v629_v7, %v629_v7  ;;  %v3379_v7 = vld [vmem:[#allocation2 + $0x38] sm:$0xff] }
 0x137   : > { %v1175_v38 = vsel %vm3164_vm4, %v1155_v60, 0  ;;  %v1515_v17 = vrot.slane %v1513_v18, 7  ;;  %v753_v60 = vpop.f32.mrf.mxu2  ;;  %v878_v25 = vshll.u32 %v3379_v7, 16 }
 0x138   : > { %663 = vst.msk [vmem:[#allocation2 + $0x44] sm:$0xf] %vm647_vm1, %v645_v8  ;;  %v756_v8 = vmax.f32 %v752_v2, 0.0  ;;  %v904_v2 = vrot.slane %v843_v39, 1  ;;  %v754_v45 = vadd.f32 %v2495_v4, %v753_v60 }
 0x13a   : > { %v758_v48 = vpack.c.bf16 %v756_v8, %v756_v8  ;;  %v1516_v8 = vshll.u32 %v3375_v12, 16  ;;  %v905_v35 = vor.u32 %v904_v2, %v840_v15  ;;  %v757_v51 = vmax.f32 %v754_v45, 0.0 }
 0x13b   : > { %1609 = vrot.lane.b32.xlu0 %v1575_v36, %s2763_s30  ;;  %v1555_v36 = vrot.slane %v1502_v47, 1  ;;  %v3945_v47 = vshrl.u32 %v3379_v7, 16 }
 0x13c   : > { %939 = vrot.lane.b32.xlu1 %v3222_v57, %s2762_s14  ;;  %v759_v4 = vpack.c.bf16 %v757_v51, %v757_v51  ;;  %v929_v57 = vsel %vm3164_vm4, %v905_v35, 0 }
 0x13d   : > { %961 = vrot.lane.b32.xlu2 %v928_v24, %s2763_s30  ;;  %v1292_v24 = vsel %vm1290_vm6, %v1271_v11, 0  ;;  %v1121_v11 = vrot.slane %v1119_v29, 7  ;;  %v877_v39 = vrot.slane %v3945_v47, 7 }
 0x13e   : > { %1300 = vmatpush.bf16.msrb.mxu3 %v1292_v24  ;;  %v1122_v24 = vshll.u32 %v3377_v30, 16  ;;  %v765_v15 = vsel %vm3384_vm7, %v759_v4, 0  ;;  %v1158_v4 = vrot.slane %v1115_v3, 1 }
 0x13f   : > { %v3424_v47 = vor.u32 %v878_v25, %v877_v39  ;;  %768 = vst.msk [vmem:[#allocation2 + $0x4c] sm:$0xf] %vm647_vm1, %v765_v15  ;;  %v3441_v45 = vld [vmem:[#allocation2 + $0x40] sm:$0xff] }
 0x140   : > { %v3443_v2 = vld [vmem:[#allocation2 + $0x40] sm:$0xff] }
 0x141   : > { %v1126_v35 = vshrl.u32 %v3443_v2, 16  ;;  %v1129_v60 = vshll.u32 %v3443_v2, 16 }
 0x143   : > { %1186 = vrot.lane.b32.xlu0 %v3154_v5, %s2762_s14  ;;  %v764_v5 = vsel %vm3384_vm7, %v758_v48, 0  ;;  %v3418_v48 = vor.u32 %v1122_v24, %v1121_v11 }
 0x144   : > { %1210 = vrot.lane.b32.xlu1 %v1175_v38, %s2763_s30  ;;  %v1556_v38 = vor.u32 %v1555_v36, %v1499_v14  ;;  %767 = vst.msk [vmem:[#allocation2 + $0x48] sm:$0xf] %vm647_vm1, %v764_v5  ;;  %v1156_v36 = vrot.slane %v1108_v50, 1  ;;  %v1557_v50 = vrot.slane %v1509_v61, 1  ;;  %v1128_v61 = vrot.slane %v1126_v35, 7 }
 0x145   : > { %1585 = vrot.lane.b32.xlu2 %v3149_v63, %s2762_s14  ;;  %v3414_v63 = vor.u32 %v1516_v8, %v1515_v17  ;;  %v1520_v17 = vshrl.u32 %v3441_v45, 16  ;;  %v1523_v5 = vshll.u32 %v3441_v45, 16 }
 0x146   : > { %v1576_v14 = vsel %vm3164_vm4, %v1556_v38, 0  ;;  %v1157_v51 = vor.u32 %v1156_v36, %v1105_v33  ;;  %v906_v33 = vrot.slane %v850_v1, 1  ;;  %v1558_v1 = vor.u32 %v1557_v50, %v1506_v34  ;;  %v1019_v36 = vld [vmem:[%s3993_s28 + $0x8] sm:$0xf] }
 0x147   : > { %v1522_v11 = vrot.slane %v1520_v17, 7  ;;  %v3471_v38 = vor.u32 %v1129_v60, %v1128_v61  ;;  %v1348_v15 = vunpack.c.l.b16 %v1019_v36 }
 0x148   : > { %v1176_v62 = vsel %vm3164_vm4, %v1157_v51, 0  ;;  %v1559_v51 = vrot.slane %v1516_v8, 1 }
 0x149   : > { %v3469_v39 = vor.u32 %v1523_v5, %v1522_v11  ;;  %v908_v11 = vrot.slane %v857_v40, 1  ;;  %v2328_v40 = vld [vmem:[%s3993_s28] sm:$0xff] }
 0x14b   : > { %1611 = vrot.lane.b32.xlu0 %v1576_v14, %s2763_s30  ;;  %v907_v14 = vor.u32 %v906_v33, %v847_v19  ;;  %v2279_v19 = vld [vmem:[%s3993_s28 + $0x20] sm:$0xf]  ;;  %v3493_v3 = vld [vmem:[#allocation2 + $0x48] sm:$0xff]  ;;  %v1350_v33 = vpack.c.b16 %v1348_v15, %v1348_v15 }
 0x14c   : > { %941 = vrot.lane.b32.xlu1 %v3278_v0, %s2762_s14  ;;  %v1159_v0 = vor.u32 %v1158_v4, %v1112_v37  ;;  %v1527_v50 = vshrl.u32 %v3493_v3, 16 }
 0x14d   : > { %963 = vrot.lane.b32.xlu2 %v929_v57, %s2763_s30  ;;  %v930_v34 = vsel %vm3164_vm4, %v907_v14, 0  ;;  %v1670_v57 = vunpack.c.l.b16 %v2279_v19 }
 0x14e   : > { %v1177_v37 = vsel %vm3164_vm4, %v1159_v0, 0  ;;  %v1529_v61 = vrot.slane %v1527_v50, 7 }
 0x153   : > { %1188 = vrot.lane.b32.xlu0 %v3229_v10, %s2762_s14  ;;  %v2337_v10 = vld [vmem:[%s3993_s28 + $0xc] sm:$0xff] }
 0x154   : > { %1212 = vrot.lane.b32.xlu1 %v1176_v62, %s2763_s30  ;;  %1301 = vmatpush.bf16.msrb.mxu3 %v2337_v10  ;;  %v1672_v62 = vpack.c.b16 %v1670_v57, %v1670_v57  ;;  %v1530_v10 = vshll.u32 %v3493_v3, 16 }
 0x155   : > { %1587 = vrot.lane.b32.xlu2 %v3224_v58, %s2762_s14  ;;  %v1577_v58 = vsel %vm3164_vm4, %v1558_v1, 0  ;;  %v1560_v1 = vor.u32 %v1559_v51, %v1513_v18  ;;  %v1160_v18 = vrot.slane %v1122_v24, 1  ;;  %v3996_v24 = vshll.u32 %v3233_v16, 16 }
 0x156   : > { %v1691_v8 = vsel %vm1290_vm6, %v1672_v62, 0  ;;  %v3515_v14 = vor.u32 %v1530_v10, %v1529_v61  ;;  %v4000_v61 = vshll.u32 %v3314_v28, 16 }
 0x157   : > { %1699 = vmatpush.bf16.msrb.mxu2 %v1691_v8  ;;  %v1578_v4 = vsel %vm3164_vm4, %v1560_v1, 0  ;;  %v910_v19 = vrot.slane %v3996_v24, 1 }
 0x158   : > { %v912_v8 = vrot.slane %v4000_v61, 1 }
 0x15b   : > { %1613 = vrot.lane.b32.xlu0 %v1577_v58, %s2763_s30  ;;  %v2346_v58 = vld [vmem:[%s3993_s28 + $0x18] sm:$0xff] }
 0x15c   : > { %943 = vrot.lane.b32.xlu1 %v3160_v9, %s2762_s14  ;;  %1700 = vmatpush.bf16.msrb.mxu2 %v2346_v58 }
 0x15d   : > { %965 = vrot.lane.b32.xlu2 %v930_v34, %s2763_s30  ;;  %v1561_v34 = vrot.slane %v1523_v5, 1 }
 0x15f   : > { %v1562_v57 = vor.u32 %v1561_v34, %v1520_v17  ;;  %v914_v34 = vrot.slane %v878_v25, 1  ;;  %v1542_v25 = vsel %vm3547_vm10, 0, %v3289_v41  ;;  %v1142_v41 = vsel %vm3547_vm10, 0, %v3293_v53 }
 0x160   : > { %v894_v53 = vsel %vm3547_vm10, 0, %v3264_v52 }
 0x161   : > { %v1579_v15 = vsel %vm3164_vm4, %v1562_v57, 0  ;;  %v4002_v57 = vshrl.u32 %v3379_v7, 16 }
 0x163   : > { %1190 = vrot.lane.b32.xlu0 %v3312_v26, %s2762_s14  ;;  %v1369_v26 = vsel %vm1290_vm6, %v1350_v33, 0 }
 0x164   : > { %1214 = vrot.lane.b32.xlu1 %v1177_v37, %s2763_s30  ;;  %1377 = vmatpush.bf16.msra.mxu1 %v1369_v26 }
 0x165   : > { %1589 = vrot.lane.b32.xlu2 %v3310_v23, %s2762_s14  ;;  %v909_v23 = vor.u32 %v908_v11, %v854_v22  ;;  %v1161_v22 = vor.u32 %v1160_v18, %v1119_v29  ;;  %v3997_v29 = vshrl.u32 %v3233_v16, 16  ;;  %v1563_v11 = vrot.slane %v1530_v10, 1 }
 0x167   : > { %v931_v9 = vsel %vm3164_vm4, %v909_v23, 0  ;;  %v1178_v0 = vsel %vm3164_vm4, %v1161_v22, 0  ;;  %v1564_v10 = vor.u32 %v1563_v11, %v1527_v50  ;;  %v4001_v23 = vshrl.u32 %v3314_v28, 16 }
 0x168   : > { %1378 = vmatpush.bf16.msra.mxu1 %v2328_v40  ;;  %v1541_v50 = vsel %vm3547_vm10, 0, %v3252_v42 }
 0x169   : > { %v913_v58 = vor.u32 %v912_v8, %v4001_v23 }
 0x16b   : > { %1615 = vrot.lane.b32.xlu0 %v1578_v4, %s2763_s30 }
 0x16c   : > { %945 = vrot.lane.b32.xlu1 %v3233_v16, %s2762_s14  ;;  %v1140_v16 = vsel %vm3547_vm10, 0, %v3186_v27 }
 0x16d   : > { %967 = vrot.lane.b32.xlu2 %v931_v9, %s2763_s30 }
 0x173   : > { %1192 = vrot.lane.b32.xlu0 %v3377_v30, %s2762_s14  ;;  %v911_v30 = vor.u32 %v910_v19, %v3997_v29  ;;  %v915_v29 = vor.u32 %v914_v34, %v4002_v57 }
 0x174   : > { %1216 = vrot.lane.b32.xlu1 %v1178_v0, %s2763_s30  ;;  %v1141_v0 = vsel %vm3547_vm10, 0, %v3254_v44 }
 0x175   : > { %1591 = vrot.lane.b32.xlu2 %v3375_v12, %s2762_s14  ;;  %v1162_v12 = vrot.slane %v1129_v60, 1  ;;  %v932_v17 = vsel %vm3164_vm4, %v911_v30, 0  ;;  %v934_v44 = vsel %vm3164_vm4, %v915_v29, 0 }
 0x176   : > { %v1181_v36 = vpop.permute.xlu0 %1180 }
 0x177   : > { %v1222_v51 = vsel %vm975_vm11, %v1140_v16, %v1181_v36  ;;  %v1163_v33 = vor.u32 %v1162_v12, %v1126_v35  ;;  %v892_v35 = vsel %vm3547_vm10, 0, %v3291_v49  ;;  %v933_v49 = vsel %vm3164_vm4, %v913_v58, 0 }
 0x178   : > { %v893_v12 = vsel %vm3547_vm10, 0, %v3194_v31  ;;  %v1544_v58 = vsel %vm3547_vm10, 0, %v3268_v54  ;;  %v1144_v54 = vsel %vm3547_vm10, 0, %v3272_v55  ;;  %v896_v55 = vsel %vm3547_vm10, 0, %v3214_v46 }
 0x179   : > { %v1179_v27 = vsel %vm3164_vm4, %v1163_v33, 0  ;;  %v1543_v33 = vsel %vm3547_vm10, 0, %v3198_v32  ;;  %v1143_v32 = vsel %vm3547_vm10, 0, %v3206_v43  ;;  %v895_v43 = vsel %vm3547_vm10, 0, %v3305_v6 }
 0x17a   : > { %v1145_v46 = vsel %vm3547_vm10, 0, %v3348_v59  ;;  %v897_v59 = vsel %vm3547_vm10, 0, %v3276_v56 }
 0x17b   : > { %1617 = vrot.lane.b32.xlu0 %v1579_v15, %s2763_s30 }
 0x17c   : > { %947 = vrot.lane.b32.xlu1 %v3314_v28, %s2762_s14 }
 0x17d   : > { %969 = vrot.lane.b32.xlu2 %v932_v17, %s2763_s30 }
 0x17e   : > { %v1205_v37 = vpop.permute.xlu0 %1204 }
 0x17f   : > { %v1245_v62 = vsel %vm1000_vm12, %v1222_v51, %v1205_v37  ;;  %v936_v60 = vpop.permute.xlu2 %935 }
 0x180   : > { %2225 = vmatmul.msk.bf16.vlgmr.msrb.gmra.mxu3 %vm1273_vm13, %v1245_v62 }
 0x183   : > { %1194 = vrot.lane.b32.xlu0 %v3443_v2, %s2762_s14  ;;  %v978_v2 = vsel %vm975_vm11, %v892_v35, %v936_v60 }
 0x184   : > { %1218 = vrot.lane.b32.xlu1 %v1179_v27, %s2763_s30 }
 0x185   : > { %1593 = vrot.lane.b32.xlu2 %v3441_v45, %s2762_s14  ;;  %v1580_v45 = vsel %vm3164_vm4, %v1564_v10, 0 }
 0x186   : > { %v1582_v26 = vpop.permute.xlu1 %1581 }
 0x187   : > { %v960_v1 = vpop.permute.xlu2 %959  ;;  %v1623_v28 = vsel %vm975_vm11, %v1541_v50, %v1582_v26  ;;  %v1183_v22 = vpop.permute.xlu0 %1182 }
 0x188   : > { %v1002_v40 = vsel %vm1000_vm12, %v978_v2, %v960_v1  ;;  %v1225_v42 = vsel %vm975_vm11, %v1141_v0, %v1183_v22 }
 0x189   : > { %2237 = vmatmul.msk.bf16.vlgmr.msra.gmra.mxu1 %vm1273_vm13, %v1002_v40 }
 0x18b   : > { %1619 = vrot.lane.b32.xlu0 %v1580_v45, %s2763_s30 }
 0x18c   : > { %949 = vrot.lane.b32.xlu1 %v3379_v7, %s2762_s14 }
 0x18d   : > { %971 = vrot.lane.b32.xlu2 %v933_v49, %s2763_s30 }
 0x18e   : > { %v1606_v4 = vpop.permute.xlu1 %1605 }
 0x18f   : > { %v1646_v18 = vsel %vm1000_vm12, %v1623_v28, %v1606_v4  ;;  %v1584_v9 = vpop.permute.xlu2 %1583 }
 0x190   : > { %2284 = vmatmul.msk.bf16.vlgmr.msrb.gmra.mxu2 %vm1273_vm13, %v1646_v18 }
 0x195   : > { %1595 = vrot.lane.b32.xlu2 %v3493_v3, %s2762_s14  ;;  %v1626_v3 = vsel %vm975_vm11, %v1542_v25, %v1584_v9 }
 0x196   : > { %v1207_v24 = vpop.permute.xlu1 %1206 }
 0x197   : > { %v962_v19 = vpop.permute.xlu2 %961  ;;  %v1247_v36 = vsel %vm1000_vm12, %v1225_v42, %v1207_v24  ;;  %v1545_v24 = vsel %vm3547_vm10, 0, %v3343_v20  ;;  %v1802_v20 = vld [vmem:[%s4003_s17] sm:$0xf]  ;;  %s1947_s17 = sshll.u32 %s3777_s21, 4  ;;  %s1948_s17 = int_to_ptr.vmem [resolvable:$true] %s1947_s17 }
 0x198   : > { %2226 = vmatmul.msk.bf16.gmra.mxu3 %vm1273_vm13, %v1247_v36 }
 0x19d   : > { %v1608_v30 = vpop.permute.xlu0 %1607  ;;  %973 = vrot.lane.b32.xlu2 %v934_v44, %s2763_s30 }
 0x19e   : > { %v938_v15 = vpop.permute.xlu1 %937  ;;  %v1648_v7 = vsel %vm1000_vm12, %v1626_v3, %v1608_v30  ;;  %v1832_v30 = vsel %vm1290_vm6, %v1802_v20, 0 }
 0x19f   : > { %v981_v17 = vsel %vm975_vm11, %v893_v12, %v938_v15  ;;  %v1586_v16 = vpop.permute.xlu2 %1585  ;;  %1841 = vmatpush.bf16.msrb.mxu0 %v1832_v30 }
 0x1a0   : > { %2285 = vmatmul.msk.bf16.gmra.mxu2 %vm1273_vm13, %v1648_v7  ;;  %v1004_v13 = vsel %vm1000_vm12, %v981_v17, %v962_v19  ;;  %v1629_v11 = vsel %vm975_vm11, %v1543_v33, %v1586_v16 }
 0x1a1   : > { %2238 = vmatmul.msk.bf16.gmra.mxu1 %vm1273_vm13, %v1004_v13  ;;  %v1546_v13 = vsel %vm3547_vm10, 0, %v3414_v63  ;;  %v1146_v63 = vsel %vm3547_vm10, 0, %v3418_v48  ;;  %v898_v48 = vsel %vm3547_vm10, 0, %v3352_v21 }
 0x1a5   : > { %v1185_v51 = vpop.permute.xlu0 %1184 }
 0x1a6   : > { %v1228_v37 = vsel %vm975_vm11, %v1142_v41, %v1185_v51  ;;  %v1209_v62 = vpop.permute.xlu1 %1208 }
 0x1a7   : > { %v964_v31 = vpop.permute.xlu2 %963  ;;  %v1249_v60 = vsel %vm1000_vm12, %v1228_v37, %v1209_v62 }
 0x1a8   : > { %2227 = vmatmul.msk.bf16.gmra.mxu3 %vm1273_vm13, %v1249_v60 }
 0x1ad   : > { %v1610_v27 = vpop.permute.xlu0 %1609 }
 0x1ae   : > { %v940_v61 = vpop.permute.xlu1 %939  ;;  %v1650_v8 = vsel %vm1000_vm12, %v1629_v11, %v1610_v27 }
 0x1af   : > { %v984_v35 = vsel %vm975_vm11, %v894_v53, %v940_v61  ;;  %v1588_v26 = vpop.permute.xlu2 %1587 }
 0x1b0   : > { %2286 = vmatmul.msk.bf16.gmra.mxu2 %vm1273_vm13, %v1650_v8  ;;  %v1006_v10 = vsel %vm1000_vm12, %v984_v35, %v964_v31  ;;  %v1632_v45 = vsel %vm975_vm11, %v1544_v58, %v1588_v26  ;;  %v1547_v8 = vsel %vm3547_vm10, 0, %v3469_v39  ;;  %v1147_v39 = vsel %vm3547_vm10, 0, %v3471_v38 }
 0x1b1   : > { %2239 = vmatmul.msk.bf16.gmra.mxu1 %vm1273_vm13, %v1006_v10 }
 0x1b5   : > { %v1187_v2 = vpop.permute.xlu0 %1186 }
 0x1b6   : > { %v1231_v1 = vsel %vm975_vm11, %v1143_v32, %v1187_v2  ;;  %v1211_v52 = vpop.permute.xlu1 %1210 }
 0x1b7   : > { %v966_v40 = vpop.permute.xlu2 %965  ;;  %v1251_v23 = vsel %vm1000_vm12, %v1231_v1, %v1211_v52 }
 0x1b8   : > { %2228 = vmatmul.msk.bf16.gmra.mxu3 %vm1273_vm13, %v1251_v23 }
 0x1bd   : > { %v1612_v49 = vpop.permute.xlu0 %1611 }
 0x1be   : > { %v942_v50 = vpop.permute.xlu1 %941  ;;  %v1652_v28 = vsel %vm1000_vm12, %v1632_v45, %v1612_v49  ;;  %v1548_v45 = vsel %vm3547_vm10, 0, %v3515_v14 }
 0x1bf   : > { %v987_v4 = vsel %vm975_vm11, %v895_v43, %v942_v50  ;;  %v1590_v18 = vpop.permute.xlu2 %1589  ;;  %v899_v50 = vsel %vm3547_vm10, 0, %v3424_v47  ;;  %v3742_v47 = vld [vmem:[%s4004_s1] ss:$0 sm:$0xff]  ;;  %s2618_s1 = sshra.s32 %s1950_s6, 4  ;;  %s2619_s1 = int_to_ptr.hbm [resolvable:$true] %s2618_s1 }
 0x1c0   : > { %2287 = vmatmul.msk.bf16.gmra.mxu2 %vm1273_vm13, %v1652_v28  ;;  %v1008_v9 = vsel %vm1000_vm12, %v987_v4, %v966_v40  ;;  %v1635_v19 = vsel %vm975_vm11, %v1545_v24, %v1590_v18  ;;  %s2620_s0 = scalar_lea.hbm %s2619_s1, 128  ;;  %p2625_p8 = scmp.lt.s32.totalorder %s2619_s1, %s4007_s4 }
 0x1c1   : > { %2240 = vmatmul.msk.bf16.gmra.mxu1 %vm1273_vm13, %v1008_v9  ;;  %p2621_p7 = scmp.ne.s32.totalorder %s2619_s1, %s2620_s0  ;;  %p2626_p9 = scmp.lt.s32.totalorder %s2624_s24, %s2620_s0 }
 0x1c3   : > { %p2622_p3 = pnand %p2621_p7, %p2986_p4  ;;  %p2627_p10 = por %p2626_p9, %p2625_p8 }
 0x1c5   : > { %v1189_v22 = vpop.permute.xlu0 %1188  ;;  %p2623_p5 = pneg %p2622_p3 }
 0x1c6   : > { %v1234_v34 = vsel %vm975_vm11, %v1144_v54, %v1189_v22  ;;  %v1213_v6 = vpop.permute.xlu1 %1212 }
 0x1c7   : > { %v968_v0 = vpop.permute.xlu2 %967  ;;  %v1253_v42 = vsel %vm1000_vm12, %v1234_v34, %v1213_v6  ;;  %p2628_p12 = pnand %p2627_p10, %p2623_p5 }
 0x1c8   : > { %2229 = vmatmul.msk.bf16.gmra.mxu3 %vm1273_vm13, %v1253_v42 }
 0x1cd   : > { %v1614_v36 = vpop.permute.xlu0 %1613 }
 0x1ce   : > { %v944_v57 = vpop.permute.xlu1 %943  ;;  %v1654_v29 = vsel %vm1000_vm12, %v1635_v19, %v1614_v36 }
 0x1cf   : > { %v990_v25 = vsel %vm975_vm11, %v896_v55, %v944_v57  ;;  %v1592_v44 = vpop.permute.xlu2 %1591 }
 0x1d0   : > { %2288 = vmatmul.msk.bf16.gmra.mxu2 %vm1273_vm13, %v1654_v29  ;;  %v1010_v3 = vsel %vm1000_vm12, %v990_v25, %v968_v0  ;;  %v1638_v41 = vsel %vm975_vm11, %v1546_v13, %v1592_v44 }
 0x1d1   : > { %2241 = vmatmul.msk.bf16.gmra.mxu1 %vm1273_vm13, %v1010_v3 }
 0x1d5   : > { %v1191_v15 = vpop.permute.xlu0 %1190 }
 0x1d6   : > { %v1237_v12 = vsel %vm975_vm11, %v1145_v46, %v1191_v15  ;;  %v1215_v7 = vpop.permute.xlu1 %1214 }
 0x1d7   : > { %v970_v17 = vpop.permute.xlu2 %969  ;;  %v1255_v16 = vsel %vm1000_vm12, %v1237_v12, %v1215_v7 }
 0x1d8   : > { %2230 = vmatmul.msk.bf16.gmra.mxu3 %vm1273_vm13, %v1255_v16 }
 0x1dd   : > { %v1616_v51 = vpop.permute.xlu0 %1615 }
 0x1de   : > { %v946_v37 = vpop.permute.xlu1 %945  ;;  %v1656_v62 = vsel %vm1000_vm12, %v1638_v41, %v1616_v51 }
 0x1df   : > { %v993_v31 = vsel %vm975_vm11, %v897_v59, %v946_v37  ;;  %v1594_v33 = vpop.permute.xlu2 %1593 }
 0x1e0   : > { %2289 = vmatmul.msk.bf16.gmra.mxu2 %vm1273_vm13, %v1656_v62  ;;  %v1012_v60 = vsel %vm1000_vm12, %v993_v31, %v970_v17  ;;  %v1641_v35 = vsel %vm975_vm11, %v1547_v8, %v1594_v33 }
 0x1e1   : > { %2242 = vmatmul.msk.bf16.gmra.mxu1 %vm1273_vm13, %v1012_v60 }
 0x1e5   : > { %v1193_v11 = vpop.permute.xlu0 %1192 }
 0x1e6   : > { %v1240_v27 = vsel %vm975_vm11, %v1146_v63, %v1193_v11  ;;  %v1217_v56 = vpop.permute.xlu1 %1216 }
 0x1e7   : > { %v1257_v53 = vsel %vm1000_vm12, %v1240_v27, %v1217_v56  ;;  %v972_v61 = vpop.permute.xlu2 %971 }
 0x1e8   : > { %2231 = vmatmul.msk.bf16.gmra.mxu3 %vm1273_vm13, %v1257_v53 }
 0x1ed   : > { %v1618_v26 = vpop.permute.xlu0 %1617 }
 0x1ee   : > { %v948_v10 = vpop.permute.xlu1 %947  ;;  %v1658_v32 = vsel %vm1000_vm12, %v1641_v35, %v1618_v26 }
 0x1ef   : > { %v996_v2 = vsel %vm975_vm11, %v898_v48, %v948_v10  ;;  %v1596_v52 = vpop.permute.xlu2 %1595 }
 0x1f0   : > { %2290 = vmatmul.msk.bf16.gmra.mxu2 %vm1273_vm13, %v1658_v32  ;;  %v1014_v1 = vsel %vm1000_vm12, %v996_v2, %v972_v61  ;;  %v1644_v49 = vsel %vm975_vm11, %v1548_v45, %v1596_v52 }
 0x1f1   : > { %2243 = vmatmul.msk.bf16.gmra.mxu1 %vm1273_vm13, %v1014_v1 }
 0x1f5   : > { %v1195_v40 = vpop.permute.xlu0 %1194 }
 0x1f6   : > { %v1243_v23 = vsel %vm975_vm11, %v1147_v39, %v1195_v40  ;;  %v1219_v21 = vpop.permute.xlu1 %1218 }
 0x1f7   : > { %v1259_v58 = vsel %vm1000_vm12, %v1243_v23, %v1219_v21  ;;  %v974_v4 = vpop.permute.xlu2 %973 }
 0x1f8   : > { %2232 = vmatmul.msk.bf16.gmra.mxu3 %vm1273_vm13, %v1259_v58 }
 0x1fd   : > { %v1620_v43 = vpop.permute.xlu0 %1619 }
 0x1fe   : > { %v950_v38 = vpop.permute.xlu1 %949  ;;  %v1660_v28 = vsel %vm1000_vm12, %v1644_v49, %v1620_v43 }
 0x1ff   : > { %v999_v18 = vsel %vm975_vm11, %v899_v50, %v950_v38 }
 0x200   : > { %2291 = vmatmul.msk.bf16.gmra.mxu2 %vm1273_vm13, %v1660_v28  ;;  %v1016_v9 = vsel %vm1000_vm12, %v999_v18, %v974_v4 }
 0x201   : > { %2244 = vmatmul.msk.bf16.gmra.mxu1 %vm1273_vm13, %v1016_v9 }
 0x203   : > { %v1303_v14 = vpop.f32.mrf.mxu3 }
 0x206   : > { %v1380_v54 = vpop.f32.mrf.mxu1 }
 0x207   : > { %v1381_v6 = vadd.f32 %v1380_v54, %v1303_v14 }
 0x20b   : > { %v1305_v22 = vpop.f32.mrf.mxu3 }
 0x20e   : > { %v1382_v0 = vpop.f32.mrf.mxu1 }
 0x20f   : > { %v1383_v42 = vadd.f32 %v1382_v0, %v1305_v22 }
 0x213   : > { %v1702_v34 = vpop.f32.mrf.mxu2 }
 0x214   : > { %v1742_v5 = vadd.f32 %v1702_v34, %v1381_v6 }
 0x216   : > { %v1762_v36 = vadd.f32 %v3742_v47, %v1742_v5 }
 0x218   : > { %v1778_v25 = vmax.f32 %v1762_v36, 0.0 }
 0x21b   : > { %v1308_v24 = vpop.f32.mrf.mxu3  ;;  %v1704_v19 = vpop.f32.mrf.mxu2 }
 0x21c   : > { %v1743_v55 = vadd.f32 %v1704_v19, %v1383_v42 }
 0x21e   : > { %v1763_v57 = vadd.f32 %v3742_v47, %v1743_v55  ;;  %v1385_v29 = vpop.f32.mrf.mxu1 }
 0x21f   : > { %v1386_v46 = vadd.f32 %v1385_v29, %v1308_v24 }
 0x220   : > { %v1779_v44 = vmax.f32 %v1763_v57, 0.0 }
 0x222   : > { %v1794_v3 = vpack.c.bf16 %v1779_v44, %v1778_v25 }
 0x223   : > { %v1310_v20 = vpop.f32.mrf.mxu3  ;;  %v1707_v30 = vpop.f32.mrf.mxu2 }
 0x224   : > { %2292 = vmatmul.msk.bf16.vlgmr.msrb.gmra.mxu0 %vm975_vm11, %v1794_v3  ;;  %v1744_v12 = vadd.f32 %v1707_v30, %v1386_v46 }
 0x226   : > { %v1387_v15 = vpop.f32.mrf.mxu1  ;;  %v1764_v13 = vadd.f32 %v3742_v47, %v1744_v12 }
 0x227   : > { %v1388_v7 = vadd.f32 %v1387_v15, %v1310_v20 }
 0x228   : > { %v1780_v37 = vmax.f32 %v1764_v13, 0.0 }
 0x22b   : > { %v1313_v17 = vpop.f32.mrf.mxu3  ;;  %v1709_v16 = vpop.f32.mrf.mxu2 }
 0x22c   : > { %v1745_v41 = vadd.f32 %v1709_v16, %v1388_v7 }
 0x22e   : > { %v1765_v51 = vadd.f32 %v3742_v47, %v1745_v41  ;;  %v1390_v59 = vpop.f32.mrf.mxu1 }
 0x22f   : > { %v1391_v63 = vadd.f32 %v1390_v59, %v1313_v17 }
 0x230   : > { %v1781_v62 = vmax.f32 %v1765_v51, 0.0 }
 0x232   : > { %v1795_v31 = vpack.c.bf16 %v1781_v62, %v1780_v37 }
 0x233   : > { %v1315_v60 = vpop.f32.mrf.mxu3  ;;  %v1712_v33 = vpop.f32.mrf.mxu2 }
 0x234   : > { %2293 = vmatmul.msk.bf16.gmra.mxu0 %vm975_vm11, %v1795_v31  ;;  %v1746_v27 = vadd.f32 %v1712_v33, %v1391_v63 }
 0x236   : > { %v1392_v11 = vpop.f32.mrf.mxu1  ;;  %v1766_v8 = vadd.f32 %v3742_v47, %v1746_v27 }
 0x237   : > { %v1393_v56 = vadd.f32 %v1392_v11, %v1315_v60 }
 0x238   : > { %v1782_v10 = vmax.f32 %v1766_v8, 0.0 }
 0x23b   : > { %v1318_v53 = vpop.f32.mrf.mxu3  ;;  %v1714_v61 = vpop.f32.mrf.mxu2 }
 0x23c   : > { %v1747_v35 = vadd.f32 %v1714_v61, %v1393_v56 }
 0x23e   : > { %v1767_v26 = vadd.f32 %v3742_v47, %v1747_v35  ;;  %v1395_v48 = vpop.f32.mrf.mxu1 }
 0x23f   : > { %v1396_v39 = vadd.f32 %v1395_v48, %v1318_v53 }
 0x240   : > { %v1783_v32 = vmax.f32 %v1767_v26, 0.0 }
 0x242   : > { %v1796_v2 = vpack.c.bf16 %v1783_v32, %v1782_v10 }
 0x243   : > { %v1320_v1 = vpop.f32.mrf.mxu3  ;;  %v1717_v52 = vpop.f32.mrf.mxu2 }
 0x244   : > { %2294 = vmatmul.msk.bf16.gmra.mxu0 %vm975_vm11, %v1796_v2  ;;  %v1748_v23 = vadd.f32 %v1717_v52, %v1396_v39 }
 0x246   : > { %v1397_v40 = vpop.f32.mrf.mxu1  ;;  %v1768_v49 = vadd.f32 %v3742_v47, %v1748_v23 }
 0x247   : > { %v1398_v21 = vadd.f32 %v1397_v40, %v1320_v1 }
 0x248   : > { %v1784_v28 = vmax.f32 %v1768_v49, 0.0 }
 0x24b   : > { %v1323_v58 = vpop.f32.mrf.mxu3  ;;  %v1719_v45 = vpop.f32.mrf.mxu2 }
 0x24c   : > { %v1749_v43 = vadd.f32 %v1719_v45, %v1398_v21 }
 0x24e   : > { %v1769_v50 = vadd.f32 %v3742_v47, %v1749_v43  ;;  %v1400_v38 = vpop.f32.mrf.mxu1 }
 0x24f   : > { %v1401_v54 = vadd.f32 %v1400_v38, %v1323_v58 }
 0x250   : > { %v1785_v4 = vmax.f32 %v1769_v50, 0.0  ;;  %v3771_v50 = vld [vmem:[%s4005_s20] ss:$0 sm:$0xff] }
 0x252   : > { %v1797_v18 = vpack.c.bf16 %v1785_v4, %v1784_v28  ;;  %v2498_v4 = vld [vmem:[%s3056_s26] sm:$0xff] }
 0x253   : > { %v1325_v9 = vpop.f32.mrf.mxu3  ;;  %v1722_v14 = vpop.f32.mrf.mxu2 }
 0x254   : > { %2295 = vmatmul.msk.bf16.gmra.mxu0 %vm975_vm11, %v1797_v18  ;;  %v1750_v34 = vadd.f32 %v1722_v14, %v1401_v54  ;;  %v2499_v54 = vld [vmem:[%s3056_s26 + $0x8] sm:$0xff] }
 0x256   : > { %v1402_v22 = vpop.f32.mrf.mxu1  ;;  %v1770_v42 = vadd.f32 %v3742_v47, %v1750_v34 }
 0x257   : > { %v1403_v6 = vadd.f32 %v1402_v22, %v1325_v9 }
 0x258   : > { %v1786_v55 = vmax.f32 %v1770_v42, 0.0 }
 0x25b   : > { %v1328_v0 = vpop.f32.mrf.mxu3  ;;  %v1724_v5 = vpop.f32.mrf.mxu2 }
 0x25c   : > { %v1751_v24 = vadd.f32 %v1724_v5, %v1403_v6  ;;  %v2500_v5 = vld [vmem:[%s3056_s26 + $0x10] sm:$0xff] }
 0x25e   : > { %v1771_v19 = vadd.f32 %v3742_v47, %v1751_v24  ;;  %v1405_v36 = vpop.f32.mrf.mxu1 }
 0x25f   : > { %v1406_v3 = vadd.f32 %v1405_v36, %v1328_v0 }
 0x260   : > { %v1787_v57 = vmax.f32 %v1771_v19, 0.0 }
 0x262   : > { %v1798_v29 = vpack.c.bf16 %v1787_v57, %v1786_v55  ;;  %v2501_v55 = vld [vmem:[%s3056_s26 + $0x18] sm:$0xff] }
 0x263   : > { %v1330_v25 = vpop.f32.mrf.mxu3  ;;  %v1727_v44 = vpop.f32.mrf.mxu2 }
 0x264   : > { %2296 = vmatmul.msk.bf16.gmra.mxu0 %vm975_vm11, %v1798_v29  ;;  %v1752_v30 = vadd.f32 %v1727_v44, %v1406_v3  ;;  %v2502_v3 = vld [vmem:[%s3056_s26 + $0x20] sm:$0xff] }
 0x266   : > { %v1407_v20 = vpop.f32.mrf.mxu1  ;;  %v1772_v7 = vadd.f32 %v3742_v47, %v1752_v30 }
 0x267   : > { %v1408_v46 = vadd.f32 %v1407_v20, %v1330_v25 }
 0x268   : > { %v1788_v41 = vmax.f32 %v1772_v7, 0.0 }
 0x26b   : > { %v1333_v15 = vpop.f32.mrf.mxu3  ;;  %v1729_v12 = vpop.f32.mrf.mxu2 }
 0x26c   : > { %v1753_v17 = vadd.f32 %v1729_v12, %v1408_v46  ;;  %v2503_v12 = vld [vmem:[%s3056_s26 + $0x28] sm:$0xff] }
 0x26e   : > { %v1773_v16 = vadd.f32 %v3742_v47, %v1753_v17  ;;  %v1410_v13 = vpop.f32.mrf.mxu1 }
 0x26f   : > { %v1411_v31 = vadd.f32 %v1410_v13, %v1333_v15 }
 0x270   : > { %v1789_v51 = vmax.f32 %v1773_v16, 0.0 }
 0x272   : > { %v1799_v59 = vpack.c.bf16 %v1789_v51, %v1788_v41  ;;  %v2504_v41 = vld [vmem:[%s3056_s26 + $0x30] sm:$0xff] }
 0x273   : > { %v1732_v37 = vpop.f32.mrf.mxu2  ;;  %v1335_v62 = vpop.f32.mrf.mxu3 }
 0x274   : > { %2297 = vmatmul.msk.bf16.gmra.mxu0 %vm975_vm11, %v1799_v59  ;;  %v1754_v33 = vadd.f32 %v1732_v37, %v1411_v31  ;;  %v2505_v31 = vld [vmem:[%s3056_s26 + $0x38] sm:$0xff] }
 0x276   : > { %v1412_v60 = vpop.f32.mrf.mxu1  ;;  %v1774_v27 = vadd.f32 %v3742_v47, %v1754_v33 }
 0x277   : > { %v1413_v63 = vadd.f32 %v1412_v60, %v1335_v62 }
 0x278   : > { %v1790_v35 = vmax.f32 %v1774_v27, 0.0  ;;  %v2506_v27 = vld [vmem:[%s3056_s26 + $0x40] sm:$0xff] }
 0x27b   : > { %v1734_v11 = vpop.f32.mrf.mxu2  ;;  %v1338_v8 = vpop.f32.mrf.mxu3 }
 0x27c   : > { %v1755_v56 = vadd.f32 %v1734_v11, %v1413_v63 }
 0x27e   : > { %v1775_v53 = vadd.f32 %v3742_v47, %v1755_v56  ;;  %v1415_v61 = vpop.f32.mrf.mxu1 }
 0x27f   : > { %v1416_v32 = vadd.f32 %v1415_v61, %v1338_v8 }
 0x280   : > { %v1791_v26 = vmax.f32 %v1775_v53, 0.0 }
 0x282   : > { %v1800_v48 = vpack.c.bf16 %v1791_v26, %v1790_v35  ;;  %v2507_v35 = vld [vmem:[%s3056_s26 + $0x48] sm:$0xff] }
 0x283   : > { %v1737_v10 = vpop.f32.mrf.mxu2  ;;  %v1340_v52 = vpop.f32.mrf.mxu3 }
 0x284   : > { %2298 = vmatmul.msk.bf16.gmra.mxu0 %vm975_vm11, %v1800_v48  ;;  %v1756_v1 = vadd.f32 %v1737_v10, %v1416_v32 }
 0x286   : > { %v1417_v2 = vpop.f32.mrf.mxu1  ;;  %v1776_v23 = vadd.f32 %v3742_v47, %v1756_v1 }
 0x287   : > { %v1418_v39 = vadd.f32 %v1417_v2, %v1340_v52  ;;  %v2508_v2 = vld [vmem:[%s3056_s26 + $0x50] sm:$0xff] }
 0x288   : > { %v1792_v45 = vmax.f32 %v1776_v23, 0.0  ;;  %v2509_v23 = vld [vmem:[%s3056_s26 + $0x58] sm:$0xff] }
 0x28b   : > { %v1739_v40 = vpop.f32.mrf.mxu2 }
 0x28c   : > { %v1757_v21 = vadd.f32 %v1739_v40, %v1418_v39 }
 0x28e   : > { %v1777_v58 = vadd.f32 %v3742_v47, %v1757_v21 }
 0x290   : > { %v1793_v49 = vmax.f32 %v1777_v58, 0.0 }
 0x292   : > { %v1801_v43 = vpack.c.bf16 %v1793_v49, %v1792_v45 }
 0x294   : > { %2299 = vmatmul.msk.bf16.gmra.mxu0 %vm975_vm11, %v1801_v43  ;;  %v2510_v43 = vld [vmem:[%s3056_s26 + $0x60] sm:$0xff] }
 0x2a1   : > { %v1843_v38 = vpop.f32.mrf.mxu0 }
 0x2a2   : > { %v1844_v28 = vadd.f32 %v3771_v50, %v1843_v38 }
 0x2a4   : > { %v1883_v18 = vadd.f32 %v2498_v4, %v1844_v28 }
 0x2a6   : > { %v1899_v9 = vmax.f32 %v1883_v18, 0.0 }
 0x2a8   : > { %1915 = vst.msk [vmem:[%s3777_s21] sm:$0xff] %vm540_vm0, %v1899_v9  ;;  %v2511_v9 = vld [vmem:[%s3056_s26 + $0x68] sm:$0xff] }
 0x2a9   : > { %v1845_v47 = vpop.f32.mrf.mxu0 }
 0x2aa   : > { %v1846_v14 = vadd.f32 %v3771_v50, %v1845_v47 }
 0x2ac   : > { %v1884_v22 = vadd.f32 %v2499_v54, %v1846_v14 }
 0x2ae   : > { %v1900_v34 = vmax.f32 %v1884_v22, 0.0 }
 0x2b0   : > { %1916 = vst.msk [vmem:[%s3777_s21 + $0x8] sm:$0xff] %vm540_vm0, %v1900_v34  ;;  %v2512_v34 = vld [vmem:[%s3056_s26 + $0x70] sm:$0xff] }
 0x2b1   : > { %v1848_v6 = vpop.f32.mrf.mxu0 }
 0x2b2   : > { %v1849_v0 = vadd.f32 %v3771_v50, %v1848_v6 }
 0x2b4   : > { %v1885_v42 = vadd.f32 %v2500_v5, %v1849_v0 }
 0x2b6   : > { %v1901_v24 = vmax.f32 %v1885_v42, 0.0 }
 0x2b8   : > { %1917 = vst.msk [vmem:[%s3777_s21 + $0x10] sm:$0xff] %vm540_vm0, %v1901_v24  ;;  %v2513_v24 = vld [vmem:[%s3056_s26 + $0x78] sm:$0xff] }
 0x2b9   : > { %v1850_v19 = vpop.f32.mrf.mxu0 }
 0x2ba   : > { %v1851_v36 = vadd.f32 %v3771_v50, %v1850_v19 }
 0x2bc   : > { %v1886_v57 = vadd.f32 %v2501_v55, %v1851_v36 }
 0x2be   : > { %v1902_v29 = vmax.f32 %v1886_v57, 0.0 }
 0x2c0   : > { %1918 = vst.msk [vmem:[%s3777_s21 + $0x18] sm:$0xff] %vm540_vm0, %v1902_v29 }
 0x2c1   : > { %v1853_v25 = vpop.f32.mrf.mxu0 }
 0x2c2   : > { %v1854_v44 = vadd.f32 %v3771_v50, %v1853_v25 }
 0x2c4   : > { %v1887_v20 = vadd.f32 %v2502_v3, %v1854_v44 }
 0x2c6   : > { %v1903_v30 = vmax.f32 %v1887_v20, 0.0 }
 0x2c8   : > { %1919 = vst.msk [vmem:[%s3777_s21 + $0x20] sm:$0xff] %vm540_vm0, %v1903_v30 }
 0x2c9   : > { %v1855_v46 = vpop.f32.mrf.mxu0 }
 0x2ca   : > { %v1856_v15 = vadd.f32 %v3771_v50, %v1855_v46 }
 0x2cc   : > { %v1888_v7 = vadd.f32 %v2503_v12, %v1856_v15 }
 0x2ce   : > { %v1904_v17 = vmax.f32 %v1888_v7, 0.0 }
 0x2d0   : > { %1920 = vst.msk [vmem:[%s3777_s21 + $0x28] sm:$0xff] %vm540_vm0, %v1904_v17 }
 0x2d1   : > { %v1858_v16 = vpop.f32.mrf.mxu0 }
 0x2d2   : > { %v1859_v13 = vadd.f32 %v3771_v50, %v1858_v16 }
 0x2d4   : > { %v1889_v51 = vadd.f32 %v2504_v41, %v1859_v13 }
 0x2d6   : > { %v1905_v59 = vmax.f32 %v1889_v51, 0.0 }
 0x2d8   : > { %1921 = vst.msk [vmem:[%s3777_s21 + $0x30] sm:$0xff] %vm540_vm0, %v1905_v59 }
 0x2d9   : > { %v1860_v37 = vpop.f32.mrf.mxu0 }
 0x2da   : > { %v1861_v62 = vadd.f32 %v3771_v50, %v1860_v37 }
 0x2dc   : > { %v1890_v60 = vadd.f32 %v2505_v31, %v1861_v62 }
 0x2de   : > { %v1906_v33 = vmax.f32 %v1890_v60, 0.0 }
 0x2e0   : > { %1922 = vst.msk [vmem:[%s3777_s21 + $0x38] sm:$0xff] %vm540_vm0, %v1906_v33 }
 0x2e1   : > { %v1863_v63 = vpop.f32.mrf.mxu0 }
 0x2e2   : > { %v1864_v11 = vadd.f32 %v3771_v50, %v1863_v63 }
 0x2e4   : > { %v1891_v56 = vadd.f32 %v2506_v27, %v1864_v11 }
 0x2e6   : > { %v1907_v53 = vmax.f32 %v1891_v56, 0.0 }
 0x2e8   : > { %1923 = vst.msk [vmem:[%s3777_s21 + $0x40] sm:$0xff] %vm540_vm0, %v1907_v53 }
 0x2e9   : > { %v1865_v61 = vpop.f32.mrf.mxu0 }
 0x2ea   : > { %v1866_v8 = vadd.f32 %v3771_v50, %v1865_v61 }
 0x2ec   : > { %v1892_v26 = vadd.f32 %v2507_v35, %v1866_v8 }
 0x2ee   : > { %v1908_v48 = vmax.f32 %v1892_v26, 0.0 }
 0x2f0   : > { %1924 = vst.msk [vmem:[%s3777_s21 + $0x48] sm:$0xff] %vm540_vm0, %v1908_v48 }
 0x2f1   : > { %v1868_v10 = vpop.f32.mrf.mxu0 }
 0x2f2   : > { %v1869_v32 = vadd.f32 %v3771_v50, %v1868_v10 }
 0x2f4   : > { %v1893_v1 = vadd.f32 %v2508_v2, %v1869_v32 }
 0x2f6   : > { %v1909_v52 = vmax.f32 %v1893_v1, 0.0 }
 0x2f8   : > { %1925 = vst.msk [vmem:[%s3777_s21 + $0x50] sm:$0xff] %vm540_vm0, %v1909_v52 }
 0x2f9   : > { %v1870_v39 = vpop.f32.mrf.mxu0 }
 0x2fa   : > { %v1871_v40 = vadd.f32 %v3771_v50, %v1870_v39 }
 0x2fc   : > { %v1894_v21 = vadd.f32 %v2509_v23, %v1871_v40 }
 0x2fe   : > { %v1910_v58 = vmax.f32 %v1894_v21, 0.0 }
 0x300   : > { %1926 = vst.msk [vmem:[%s3777_s21 + $0x58] sm:$0xff] %vm540_vm0, %v1910_v58 }
 0x301   : > { %v1873_v45 = vpop.f32.mrf.mxu0 }
 0x302   : > { %v1874_v49 = vadd.f32 %v3771_v50, %v1873_v45 }
 0x304   : > { %v1895_v38 = vadd.f32 %v2510_v43, %v1874_v49 }
 0x306   : > { %v1911_v28 = vmax.f32 %v1895_v38, 0.0 }
 0x308   : > { %1927 = vst.msk [vmem:[%s3777_s21 + $0x60] sm:$0xff] %vm540_vm0, %v1911_v28 }
 0x309   : > { %v1875_v4 = vpop.f32.mrf.mxu0 }
 0x30a   : > { %v1876_v18 = vadd.f32 %v3771_v50, %v1875_v4 }
 0x30c   : > { %v1896_v47 = vadd.f32 %v2511_v9, %v1876_v18 }
 0x30e   : > { %v1912_v14 = vmax.f32 %v1896_v47, 0.0 }
 0x310   : > { %1928 = vst.msk [vmem:[%s3777_s21 + $0x68] sm:$0xff] %vm540_vm0, %v1912_v14 }
 0x311   : > { %v1878_v54 = vpop.f32.mrf.mxu0 }
 0x312   : > { %v1879_v22 = vadd.f32 %v3771_v50, %v1878_v54 }
 0x314   : > { %v1897_v6 = vadd.f32 %v2512_v34, %v1879_v22 }
 0x316   : > { %v1913_v0 = vmax.f32 %v1897_v6, 0.0 }
 0x318   : > { %1929 = vst.msk [vmem:[%s3777_s21 + $0x70] sm:$0xff] %vm540_vm0, %v1913_v0 }
 0x319   : > { %v1880_v5 = vpop.f32.mrf.mxu0 }
 0x31a   : > { %v1881_v42 = vadd.f32 %v3771_v50, %v1880_v5 }
 0x31c   : > { %v1898_v19 = vadd.f32 %v2513_v24, %v1881_v42 }
 0x31e   : > { %v1914_v36 = vmax.f32 %v1898_v19, 0.0 }
 0x320   : > { %1930 = vst.msk [vmem:[%s3777_s21 + $0x78] sm:$0xff] %vm540_vm0, %v1914_v36 }
 0x321   : > { %2631 = shalt.err (!%p2628_p12)
}
 0x322   : > { %s2764_s25 = smov 128  }
 0x323   : > { %2358 = dma.vmem_to_hbm [thread:$0]  (%p2986_p4), %s1948_s17, 2048, %s1950_s6, %s1932_s3, %s2764_s25, %s2764_s25, %s2762_s14  }
 0x324 PF: > { %s4008_s21 = sld [smem:[#allocation15_spill]]  ;;  %p2375_p13 = scmp.ge.s32.totalorder %s2758_s22, 2 }
 0x326   : > { %p2371_p1 = pnand %p2375_p13, %p2990_p6 }
 0x328   : > { %p2372_p2 = pneg %p2371_p1 }
 0x32a   : > { %s1964_s23 = sand.u32 1, %s4008_s21  }
 0x32b   : > { %s1965_s27 = scalar_lea.sflag [#allocation5], %s1964_s23 }
 0x32c   : > { %2701 = dma.done.wait (%p2372_p2), %s1965_s27, 2048  }
 0x32d   : > { %2703 = vsyncadd (%p2372_p2), %s1965_s27, 4294965248  ;;  %s28_s22 = sadd.s32 1, %s2758_s22   ;;  %s4011_s8 = sld [smem:[#allocation14_spill]] }
 0x32e   : > { %p3864_p11 = scmp.ge.s32.totalorder %s28_s22, 6   ;;  %s4012_s14 = sld [smem:[#allocation24_spill]] }
 0x32f   : > { %s4013_s5 = sld [smem:[#allocation16_spill]]  ;;  %s4020_s30 = smov %s2710_s10 }
 0x330   : > { %s4014_s17 = sld [smem:[#allocation25_spill]]  ;;  %s4021_s10 = smov %s2714_s11 }
 0x331   : > { %s4015_s18 = sld [smem:[#allocation19_spill]]  ;;  %s4022_s11 = smov %s3033_s29 }
 0x332   : > { %s4016_s19 = sld [smem:[#allocation20_spill]]  ;;  %s4023_s12 = smov %s2722_s13 }
 0x333   : > { %s4017_s20 = sld [smem:[#allocation21_spill]]  ;;  %s4024_s13 = smov %s4011_s8 }
 0x334   : > { %s4018_s21 = sld [smem:[#allocation22_spill]]  ;;  %s4025_s15 = smov %s2734_s16 }
 0x335   : > { %s4026_s16 = smov %s4013_s5  ;;  %27 = sbr.rel (!%p3864_p11) target bundleno = 22 (0x16), region = 130 }
 0x33a   :  { %1971 = vsyncpa [#allocation4], 1 }
 0x33b   :  { %1973 = vsyncpa [#allocation4 + $0x1], 1 }
 0x33c   :  { %1974 = vsyncpa [#allocation7], 1 }
 0x33d   :  { %1976 = vsyncpa [#allocation7 + $0x1], 1 }
 0x33e   :  { %1977 = vsyncpa [#allocation5], 1 }
 0x33f   :  { %1979 = vsyncpa [#allocation5 + $0x1], 1 }

</bundles_post_ra>
